<compile_context>
chip_gen: v5e
topology: v5e:2x2
jax: 0.10.0
libtpu: 0.0.40
codegen_flags: <defaults>
</compile_context>

<pallas_src>
import functools
import math

import jax
import jax.numpy as jnp
from jax.experimental import pallas as pl
from jax.experimental.pallas import tpu as pltpu


# ---------------------------------------------------------------------------
# Static shape plan (mirrors CnnModel.__init__ block construction)
# ---------------------------------------------------------------------------
def _n_blocks(max_length, output_size_factor):
    # floor(log_b(m)) as in the reference module, made robust to FP rounding
    # when max_length is an exact power of the factor.
    n = int(math.floor(math.log(max_length, output_size_factor)))
    if output_size_factor ** (n + 1) <= max_length:
        n += 1
    return n


def build_plan(*, in_channels, filter_sizes, num_filters, max_length,
               output_size_factor):
    """Per-branch / per-block static shapes (k, c_in, c_out, L, out_size, window)."""
    n_blocks = _n_blocks(max_length, output_size_factor)
    plan = []
    for ksz, nf in zip(filter_sizes, num_filters):
        assert ksz % 2 == 1, "odd kernel sizes -> symmetric 'same' padding"
        branch = []
        c_in = in_channels
        L = max_length
        for i in range(n_blocks):
            out_size = max_length // output_size_factor ** (i + 1)
            # AdaptiveMaxPool1d reduces to fixed non-overlapping windows here.
            assert L % out_size == 0, "L must be divisible by pool output size"
            branch.append(dict(k=ksz, c_in=c_in, c_out=nf, L=L,
                               out_size=out_size, window=L // out_size))
            c_in = nf
            L = out_size
        assert branch[-1]["out_size"] == 1, "final block must pool to length 1"
        plan.append(branch)
    return plan


# ---------------------------------------------------------------------------
# Fused forward kernel: all branches, all ConvBlocks, final FC.
# ---------------------------------------------------------------------------
def _cnn_forward_kernel(x_ref, *refs, plan, apply_layernorm, eps):
    # refs = [w, b, gamma, beta] per block (branch-major), fc_w, fc_b, out_ref
    out_ref = refs[-1]
    params = refs[:-1]
    Bt = x_ref.shape[0]                   # batch tile

    x0 = x_ref[...]                       # (Bt, L0, C_in), loaded once
    feats = []
    idx = 0
    for branch in plan:
        x = x0
        for blk in branch:
            w_ref, b_ref, g_ref, be_ref = params[idx:idx + 4]
            idx += 4
            k, c_in, c_out = blk["k"], blk["c_in"], blk["c_out"]
            L, out_size, window = blk["L"], blk["out_size"], blk["window"]
            pad = (k - 1) // 2

            # -- Conv1d 'same' as one im2col matmul --------------------------
            zeros = jnp.zeros((Bt, pad, c_in), jnp.float32)
            x_pad = jnp.concatenate([zeros, x, zeros], axis=1)   # (Bt, L+2p, C)
            patches = jnp.concatenate(
                [x_pad[:, t:t + L, :] for t in range(k)], axis=-1)  # (Bt, L, k*C)
            flat = patches.reshape(Bt * L, k * c_in)
            y = jnp.dot(flat, w_ref[...],
                        preferred_element_type=jnp.float32) + b_ref[...]

            # -- LayerNorm over channels (one-pass moments) ------------------
            if apply_layernorm:
                mean = jnp.mean(y, axis=-1, keepdims=True)
                mean_sq = jnp.mean(y * y, axis=-1, keepdims=True)
                var = jnp.maximum(mean_sq - mean * mean, 0.0)
                y = (y - mean) * jax.lax.rsqrt(var + eps)
                y = y * g_ref[...] + be_ref[...]

            # -- ReLU + adaptive max pool (reshape + reduce) -----------------
            y = jnp.maximum(y, 0.0)
            x = jnp.max(y.reshape(Bt, out_size, window, c_out), axis=2)

        # final block has out_size == 1 -> torch .squeeze() => (Bt, c_out)
        feats.append(x.reshape(Bt, branch[-1]["c_out"]))

    fc_w_ref, fc_b_ref = params[idx], params[idx + 1]
    feat = jnp.concatenate(feats, axis=-1)             # (Bt, total_filters)
    out_ref[...] = (jnp.dot(feat, fc_w_ref[...],
                            preferred_element_type=jnp.float32) + fc_b_ref[...])


def cnn_model_forward(params, input_states, attention_mask, *, plan,
                      apply_layernorm, eps=1e-5, batch_block=None):
    # attention_mask is accepted but unused — matches the PyTorch forward.
    del attention_mask
    # config.in_channels is an int here, so self.mlp is None and
    # `inputs = input_states`, exactly as in the reference module.
    B, L, C = input_states.shape
    total = params["fc_w"].shape[1]

    # Batch is the only grid axis.  Default: whole batch in one tile (toy
    # shapes fit VMEM with huge margin); for large B pick a tile that is a
    # multiple of 8 (sublane constraint) and divides B.
    if batch_block is None:
        batch_block = B
    batch_block = min(batch_block, B)
    if batch_block != B and (batch_block % 8 != 0 or B % batch_block != 0):
        batch_block = B
    grid = (B // batch_block,)

    flat_args = [input_states]
    for blocks in params["branches"]:
        for blk in blocks:
            flat_args += [blk["w"], blk["b"], blk["gamma"], blk["beta"]]
    flat_args += [params["fc_w"], params["fc_b"]]

    def resident_spec(arr):
        # Full-shape block with a constant index map: same block at every grid
        # step, so Pallas DMAs it into VMEM once and keeps it resident.
        nd = arr.ndim
        return pl.BlockSpec(arr.shape, lambda i, nd=nd: (0,) * nd)

    in_specs = [pl.BlockSpec((batch_block, L, C), lambda i: (i, 0, 0))]
    in_specs += [resident_spec(a) for a in flat_args[1:]]
    out_specs = pl.BlockSpec((batch_block, total), lambda i: (i, 0))

    kernel = functools.partial(_cnn_forward_kernel, plan=plan,
                               apply_layernorm=apply_layernorm, eps=eps)
    return pl.pallas_call(
        kernel,
        out_shape=jax.ShapeDtypeStruct((B, total), jnp.float32),
        grid=grid,
        in_specs=in_specs,
        out_specs=out_specs,
        compiler_params=pltpu.CompilerParams(
            dimension_semantics=("parallel",)),
    )(*flat_args)


# ---------------------------------------------------------------------------
# Pure-JAX reference (lax.conv) for numerical validation of the fused kernel.
# ---------------------------------------------------------------------------
def reference_forward(params, x, *, plan, apply_layernorm, eps=1e-5):
    feats = []
    for branch, blocks in zip(plan, params["branches"]):
        h = x
        for blk, p in zip(branch, blocks):
            k, c_in, c_out = blk["k"], blk["c_in"], blk["c_out"]
            w = p["w"].reshape(k, c_in, c_out)            # tap-major layout
            y = jax.lax.conv_general_dilated(
                h, w, window_strides=(1,), padding="SAME",
                dimension_numbers=("NWC", "WIO", "NWC"))
            y = y + p["b"]
            if apply_layernorm:
                mean = jnp.mean(y, axis=-1, keepdims=True)
                var = jnp.mean((y - mean) ** 2, axis=-1, keepdims=True)
                y = (y - mean) / jnp.sqrt(var + eps)
                y = y * p["gamma"] + p["beta"]
            y = jnp.maximum(y, 0.0)
            Bx = y.shape[0]
            y = y.reshape(Bx, blk["out_size"], blk["window"], c_out).max(axis=2)
            h = y
        feats.append(h.reshape(h.shape[0], -1))
    feat = jnp.concatenate(feats, axis=-1)
    return feat @ params["fc_w"] + params["fc_b"]


# ---------------------------------------------------------------------------
# Parameter init (deterministic, PyTorch-default-style uniform fan-in bounds).
# Conv weights are stored directly in im2col layout (k*C_in, C_out) with row
# index t*C_in + c  (tap-major), matching the in-kernel patch construction.
# ---------------------------------------------------------------------------
def init_params(key, *, plan, num_filters):
    params = {"branches": []}
    for branch in plan:
        blocks = []
        for blk in branch:
            k, c_in, c_out = blk["k"], blk["c_in"], blk["c_out"]
            key, k1, k2 = jax.random.split(key, 3)
            bound = 1.0 / math.sqrt(c_in * k)
            w = jax.random.uniform(k1, (k, c_in, c_out), jnp.float32,
                                   -bound, bound).reshape(k * c_in, c_out)
            b = jax.random.uniform(k2, (1, c_out), jnp.float32, -bound, bound)
            blocks.append(dict(w=w, b=b,
                               gamma=jnp.ones((1, c_out), jnp.float32),
                               beta=jnp.zeros((1, c_out), jnp.float32)))
        params["branches"].append(blocks)
    total = sum(num_filters)
    key, k1, k2 = jax.random.split(key, 3)
    bound = 1.0 / math.sqrt(total)
    params["fc_w"] = jax.random.uniform(k1, (total, total), jnp.float32,
                                        -bound, bound)   # stored as (in, out)
    params["fc_b"] = jax.random.uniform(k2, (1, total), jnp.float32,
                                        -bound, bound)
    return params


if __name__ == "__main__":
    # Small config consistent with the module:
    #   max_length=8, output_size_factor=2 -> 3 blocks/branch (pool 4, 2, 1)
    B, L, C = 2, 8, 4
    filter_sizes = (3, 5)
    num_filters = (8, 8)
    output_size_factor = 2
    apply_layernorm = True

    plan = build_plan(in_channels=C, filter_sizes=filter_sizes,
                      num_filters=num_filters, max_length=L,
                      output_size_factor=output_size_factor)

    key = jax.random.PRNGKey(0)
    kp, kx = jax.random.split(key)
    params = init_params(kp, plan=plan, num_filters=num_filters)

    input_states = jax.random.normal(kx, (B, L, C), jnp.float32)
    attention_mask = jnp.ones((B, L), jnp.int32)

    out = cnn_model_forward(params, input_states, attention_mask,
                            plan=plan, apply_layernorm=apply_layernorm)
    jax.block_until_ready(out)
    assert out.shape == (B, sum(num_filters)), out.shape
    assert jnp.all(jnp.isfinite(out))

    # Numerical sanity check against a pure-JAX lax.conv reference
    # (tolerance is generous to absorb MXU f32 multi-pass matmul differences).
    ref = reference_forward(params, input_states, plan=plan,
                            apply_layernorm=apply_layernorm)
    jax.block_until_ready(ref)
    assert jnp.allclose(out, ref, rtol=1e-2, atol=1e-2), \
        float(jnp.max(jnp.abs(out - ref)))

    print("KERNEL_OK")
</pallas_src>

<mosaic_0001>
module attributes {stable_mosaic.version = 11 : i64} {
  func.func @_cnn_forward_kernel(%arg0: i32, %arg1: memref<2x8x4xf32, #tpu.memory_space<vmem>>, %arg2: memref<12x8xf32, #tpu.memory_space<vmem>>, %arg3: memref<1x8xf32, #tpu.memory_space<vmem>>, %arg4: memref<1x8xf32, #tpu.memory_space<vmem>>, %arg5: memref<1x8xf32, #tpu.memory_space<vmem>>, %arg6: memref<24x8xf32, #tpu.memory_space<vmem>>, %arg7: memref<1x8xf32, #tpu.memory_space<vmem>>, %arg8: memref<1x8xf32, #tpu.memory_space<vmem>>, %arg9: memref<1x8xf32, #tpu.memory_space<vmem>>, %arg10: memref<24x8xf32, #tpu.memory_space<vmem>>, %arg11: memref<1x8xf32, #tpu.memory_space<vmem>>, %arg12: memref<1x8xf32, #tpu.memory_space<vmem>>, %arg13: memref<1x8xf32, #tpu.memory_space<vmem>>, %arg14: memref<20x8xf32, #tpu.memory_space<vmem>>, %arg15: memref<1x8xf32, #tpu.memory_space<vmem>>, %arg16: memref<1x8xf32, #tpu.memory_space<vmem>>, %arg17: memref<1x8xf32, #tpu.memory_space<vmem>>, %arg18: memref<40x8xf32, #tpu.memory_space<vmem>>, %arg19: memref<1x8xf32, #tpu.memory_space<vmem>>, %arg20: memref<1x8xf32, #tpu.memory_space<vmem>>, %arg21: memref<1x8xf32, #tpu.memory_space<vmem>>, %arg22: memref<40x8xf32, #tpu.memory_space<vmem>>, %arg23: memref<1x8xf32, #tpu.memory_space<vmem>>, %arg24: memref<1x8xf32, #tpu.memory_space<vmem>>, %arg25: memref<1x8xf32, #tpu.memory_space<vmem>>, %arg26: memref<16x16xf32, #tpu.memory_space<vmem>>, %arg27: memref<1x16xf32, #tpu.memory_space<vmem>>, %arg28: memref<2x16xf32, #tpu.memory_space<vmem>>) attributes {dimension_semantics = [#tpu.dimension_semantics<parallel>], iteration_bounds = array<i64: 1>, scalar_prefetch = 0 : i64, scratch_operands = 0 : i64, tpu.core_type = #tpu.core_type<tc>, window_params = [{transform_indices = @transform_0, window_bounds = array<i64: 2, 8, 4>}, {pipeline_mode = #tpu.pipeline_mode<synchronous>, transform_indices = @transform_1, window_bounds = array<i64: 12, 8>}, {pipeline_mode = #tpu.pipeline_mode<synchronous>, transform_indices = @transform_2, window_bounds = array<i64: 1, 8>}, {pipeline_mode = #tpu.pipeline_mode<synchronous>, transform_indices = @transform_3, window_bounds = array<i64: 1, 8>}, {pipeline_mode = #tpu.pipeline_mode<synchronous>, transform_indices = @transform_4, window_bounds = array<i64: 1, 8>}, {pipeline_mode = #tpu.pipeline_mode<synchronous>, transform_indices = @transform_5, window_bounds = array<i64: 24, 8>}, {pipeline_mode = #tpu.pipeline_mode<synchronous>, transform_indices = @transform_6, window_bounds = array<i64: 1, 8>}, {pipeline_mode = #tpu.pipeline_mode<synchronous>, transform_indices = @transform_7, window_bounds = array<i64: 1, 8>}, {pipeline_mode = #tpu.pipeline_mode<synchronous>, transform_indices = @transform_8, window_bounds = array<i64: 1, 8>}, {pipeline_mode = #tpu.pipeline_mode<synchronous>, transform_indices = @transform_9, window_bounds = array<i64: 24, 8>}, {pipeline_mode = #tpu.pipeline_mode<synchronous>, transform_indices = @transform_10, window_bounds = array<i64: 1, 8>}, {pipeline_mode = #tpu.pipeline_mode<synchronous>, transform_indices = @transform_11, window_bounds = array<i64: 1, 8>}, {pipeline_mode = #tpu.pipeline_mode<synchronous>, transform_indices = @transform_12, window_bounds = array<i64: 1, 8>}, {pipeline_mode = #tpu.pipeline_mode<synchronous>, transform_indices = @transform_13, window_bounds = array<i64: 20, 8>}, {pipeline_mode = #tpu.pipeline_mode<synchronous>, transform_indices = @transform_14, window_bounds = array<i64: 1, 8>}, {pipeline_mode = #tpu.pipeline_mode<synchronous>, transform_indices = @transform_15, window_bounds = array<i64: 1, 8>}, {pipeline_mode = #tpu.pipeline_mode<synchronous>, transform_indices = @transform_16, window_bounds = array<i64: 1, 8>}, {pipeline_mode = #tpu.pipeline_mode<synchronous>, transform_indices = @transform_17, window_bounds = array<i64: 40, 8>}, {pipeline_mode = #tpu.pipeline_mode<synchronous>, transform_indices = @transform_18, window_bounds = array<i64: 1, 8>}, {pipeline_mode = #tpu.pipeline_mode<synchronous>, transform_indices = @transform_19, window_bounds = array<i64: 1, 8>}, {pipeline_mode = #tpu.pipeline_mode<synchronous>, transform_indices = @transform_20, window_bounds = array<i64: 1, 8>}, {pipeline_mode = #tpu.pipeline_mode<synchronous>, transform_indices = @transform_21, window_bounds = array<i64: 40, 8>}, {pipeline_mode = #tpu.pipeline_mode<synchronous>, transform_indices = @transform_22, window_bounds = array<i64: 1, 8>}, {pipeline_mode = #tpu.pipeline_mode<synchronous>, transform_indices = @transform_23, window_bounds = array<i64: 1, 8>}, {pipeline_mode = #tpu.pipeline_mode<synchronous>, transform_indices = @transform_24, window_bounds = array<i64: 1, 8>}, {pipeline_mode = #tpu.pipeline_mode<synchronous>, transform_indices = @transform_25, window_bounds = array<i64: 16, 16>}, {pipeline_mode = #tpu.pipeline_mode<synchronous>, transform_indices = @transform_26, window_bounds = array<i64: 1, 16>}, {transform_indices = @transform_27, window_bounds = array<i64: 2, 16>}]} {
    %c0 = arith.constant 0 : index
    %c0_0 = arith.constant 0 : index
    %c0_1 = arith.constant 0 : index
    %0 = vector.load %arg1[%c0, %c0_0, %c0_1] : memref<2x8x4xf32, #tpu.memory_space<vmem>>, vector<2x8x4xf32>
    %cst = arith.constant 0.000000e+00 : f32
    %1 = vector.broadcast %cst : f32 to vector<2x1x4xf32>
    %2 = tpu.concatenate %1, %0, %1 in 1 : vector<2x1x4xf32>, vector<2x8x4xf32>, vector<2x1x4xf32> -> vector<2x10x4xf32>
    %3 = vector.extract_strided_slice %2 {offsets = [0, 0, 0], sizes = [2, 8, 4], strides = [1, 1, 1]} : vector<2x10x4xf32> to vector<2x8x4xf32>
    %4 = vector.extract_strided_slice %2 {offsets = [0, 1, 0], sizes = [2, 8, 4], strides = [1, 1, 1]} : vector<2x10x4xf32> to vector<2x8x4xf32>
    %5 = vector.extract_strided_slice %2 {offsets = [0, 2, 0], sizes = [2, 8, 4], strides = [1, 1, 1]} : vector<2x10x4xf32> to vector<2x8x4xf32>
    %6 = tpu.concatenate %3, %4, %5 in 2 : vector<2x8x4xf32>, vector<2x8x4xf32>, vector<2x8x4xf32> -> vector<2x8x12xf32>
    %7 = vector.shape_cast %6 : vector<2x8x12xf32> to vector<16x12xf32>
    %c0_2 = arith.constant 0 : index
    %c0_3 = arith.constant 0 : index
    %8 = vector.load %arg2[%c0_2, %c0_3] : memref<12x8xf32, #tpu.memory_space<vmem>>, vector<12x8xf32>
    %cst_4 = arith.constant dense<0.000000e+00> : vector<16x8xf32>
    %9 = tpu.matmul %7, %8, %cst_4 {dimension_numbers = #tpu.dot_dimension_numbers<[1], [0], [0], [1], [0, 0, 1, 1], [], []>} : vector<16x12xf32>, vector<12x8xf32>, vector<16x8xf32> -> vector<16x8xf32>
    %c0_5 = arith.constant 0 : index
    %c0_6 = arith.constant 0 : index
    %10 = vector.load %arg3[%c0_5, %c0_6] : memref<1x8xf32, #tpu.memory_space<vmem>>, vector<1x8xf32>
    %11 = vector.broadcast %10 : vector<1x8xf32> to vector<16x8xf32>
    %12 = arith.addf %9, %11 : vector<16x8xf32>
    %cst_7 = arith.constant dense<0.000000e+00> : vector<16xf32>
    %13 = vector.multi_reduction <add>, %12, %cst_7 [1] : vector<16x8xf32> to vector<16xf32>
    %14 = vector.shape_cast %13 : vector<16xf32> to vector<16x1xf32>
    %cst_8 = arith.constant 8.000000e+00 : f32
    %15 = vector.broadcast %cst_8 : f32 to vector<16x1xf32>
    %16 = arith.divf %14, %15 : vector<16x1xf32>
    %17 = arith.mulf %12, %12 : vector<16x8xf32>
    %cst_9 = arith.constant dense<0.000000e+00> : vector<16xf32>
    %18 = vector.multi_reduction <add>, %17, %cst_9 [1] : vector<16x8xf32> to vector<16xf32>
    %19 = vector.shape_cast %18 : vector<16xf32> to vector<16x1xf32>
    %cst_10 = arith.constant 8.000000e+00 : f32
    %20 = vector.broadcast %cst_10 : f32 to vector<16x1xf32>
    %21 = arith.divf %19, %20 : vector<16x1xf32>
    %22 = arith.mulf %16, %16 : vector<16x1xf32>
    %23 = arith.subf %21, %22 : vector<16x1xf32>
    %cst_11 = arith.constant 0.000000e+00 : f32
    %24 = vector.broadcast %cst_11 : f32 to vector<16x1xf32>
    %25 = arith.maximumf %23, %24 : vector<16x1xf32>
    %26 = vector.broadcast %16 : vector<16x1xf32> to vector<16x8xf32>
    %27 = arith.subf %12, %26 : vector<16x8xf32>
    %cst_12 = arith.constant 9.99999974E-6 : f32
    %28 = vector.broadcast %cst_12 : f32 to vector<16x1xf32>
    %29 = arith.addf %25, %28 : vector<16x1xf32>
    %30 = math.rsqrt %29 : vector<16x1xf32>
    %31 = vector.broadcast %30 : vector<16x1xf32> to vector<16x8xf32>
    %32 = arith.mulf %27, %31 : vector<16x8xf32>
    %c0_13 = arith.constant 0 : index
    %c0_14 = arith.constant 0 : index
    %33 = vector.load %arg4[%c0_13, %c0_14] : memref<1x8xf32, #tpu.memory_space<vmem>>, vector<1x8xf32>
    %34 = vector.broadcast %33 : vector<1x8xf32> to vector<16x8xf32>
    %35 = arith.mulf %32, %34 : vector<16x8xf32>
    %c0_15 = arith.constant 0 : index
    %c0_16 = arith.constant 0 : index
    %36 = vector.load %arg5[%c0_15, %c0_16] : memref<1x8xf32, #tpu.memory_space<vmem>>, vector<1x8xf32>
    %37 = vector.broadcast %36 : vector<1x8xf32> to vector<16x8xf32>
    %38 = arith.addf %35, %37 : vector<16x8xf32>
    %cst_17 = arith.constant 0.000000e+00 : f32
    %39 = vector.broadcast %cst_17 : f32 to vector<16x8xf32>
    %40 = arith.maximumf %38, %39 : vector<16x8xf32>
    %41 = vector.shape_cast %40 : vector<16x8xf32> to vector<2x4x2x8xf32>
    %cst_18 = arith.constant dense<0xFF800000> : vector<2x4x8xf32>
    %42 = vector.multi_reduction <maximumf>, %41, %cst_18 [2] : vector<2x4x2x8xf32> to vector<2x4x8xf32>
    %cst_19 = arith.constant 0.000000e+00 : f32
    %43 = vector.broadcast %cst_19 : f32 to vector<2x1x8xf32>
    %44 = tpu.concatenate %43, %42, %43 in 1 : vector<2x1x8xf32>, vector<2x4x8xf32>, vector<2x1x8xf32> -> vector<2x6x8xf32>
    %45 = vector.extract_strided_slice %44 {offsets = [0, 0, 0], sizes = [2, 4, 8], strides = [1, 1, 1]} : vector<2x6x8xf32> to vector<2x4x8xf32>
    %46 = vector.extract_strided_slice %44 {offsets = [0, 1, 0], sizes = [2, 4, 8], strides = [1, 1, 1]} : vector<2x6x8xf32> to vector<2x4x8xf32>
    %47 = vector.extract_strided_slice %44 {offsets = [0, 2, 0], sizes = [2, 4, 8], strides = [1, 1, 1]} : vector<2x6x8xf32> to vector<2x4x8xf32>
    %48 = tpu.concatenate %45, %46, %47 in 2 : vector<2x4x8xf32>, vector<2x4x8xf32>, vector<2x4x8xf32> -> vector<2x4x24xf32>
    %49 = vector.shape_cast %48 : vector<2x4x24xf32> to vector<8x24xf32>
    %c0_20 = arith.constant 0 : index
    %c0_21 = arith.constant 0 : index
    %50 = vector.load %arg6[%c0_20, %c0_21] : memref<24x8xf32, #tpu.memory_space<vmem>>, vector<24x8xf32>
    %cst_22 = arith.constant dense<0.000000e+00> : vector<8x8xf32>
    %51 = tpu.matmul %49, %50, %cst_22 {dimension_numbers = #tpu.dot_dimension_numbers<[1], [0], [0], [1], [0, 0, 1, 1], [], []>} : vector<8x24xf32>, vector<24x8xf32>, vector<8x8xf32> -> vector<8x8xf32>
    %c0_23 = arith.constant 0 : index
    %c0_24 = arith.constant 0 : index
    %52 = vector.load %arg7[%c0_23, %c0_24] : memref<1x8xf32, #tpu.memory_space<vmem>>, vector<1x8xf32>
    %53 = vector.broadcast %52 : vector<1x8xf32> to vector<8x8xf32>
    %54 = arith.addf %51, %53 : vector<8x8xf32>
    %cst_25 = arith.constant dense<0.000000e+00> : vector<8xf32>
    %55 = vector.multi_reduction <add>, %54, %cst_25 [1] : vector<8x8xf32> to vector<8xf32>
    %56 = vector.shape_cast %55 : vector<8xf32> to vector<8x1xf32>
    %cst_26 = arith.constant 8.000000e+00 : f32
    %57 = vector.broadcast %cst_26 : f32 to vector<8x1xf32>
    %58 = arith.divf %56, %57 : vector<8x1xf32>
    %59 = arith.mulf %54, %54 : vector<8x8xf32>
    %cst_27 = arith.constant dense<0.000000e+00> : vector<8xf32>
    %60 = vector.multi_reduction <add>, %59, %cst_27 [1] : vector<8x8xf32> to vector<8xf32>
    %61 = vector.shape_cast %60 : vector<8xf32> to vector<8x1xf32>
    %cst_28 = arith.constant 8.000000e+00 : f32
    %62 = vector.broadcast %cst_28 : f32 to vector<8x1xf32>
    %63 = arith.divf %61, %62 : vector<8x1xf32>
    %64 = arith.mulf %58, %58 : vector<8x1xf32>
    %65 = arith.subf %63, %64 : vector<8x1xf32>
    %cst_29 = arith.constant 0.000000e+00 : f32
    %66 = vector.broadcast %cst_29 : f32 to vector<8x1xf32>
    %67 = arith.maximumf %65, %66 : vector<8x1xf32>
    %68 = vector.broadcast %58 : vector<8x1xf32> to vector<8x8xf32>
    %69 = arith.subf %54, %68 : vector<8x8xf32>
    %cst_30 = arith.constant 9.99999974E-6 : f32
    %70 = vector.broadcast %cst_30 : f32 to vector<8x1xf32>
    %71 = arith.addf %67, %70 : vector<8x1xf32>
    %72 = math.rsqrt %71 : vector<8x1xf32>
    %73 = vector.broadcast %72 : vector<8x1xf32> to vector<8x8xf32>
    %74 = arith.mulf %69, %73 : vector<8x8xf32>
    %c0_31 = arith.constant 0 : index
    %c0_32 = arith.constant 0 : index
    %75 = vector.load %arg8[%c0_31, %c0_32] : memref<1x8xf32, #tpu.memory_space<vmem>>, vector<1x8xf32>
    %76 = vector.broadcast %75 : vector<1x8xf32> to vector<8x8xf32>
    %77 = arith.mulf %74, %76 : vector<8x8xf32>
    %c0_33 = arith.constant 0 : index
    %c0_34 = arith.constant 0 : index
    %78 = vector.load %arg9[%c0_33, %c0_34] : memref<1x8xf32, #tpu.memory_space<vmem>>, vector<1x8xf32>
    %79 = vector.broadcast %78 : vector<1x8xf32> to vector<8x8xf32>
    %80 = arith.addf %77, %79 : vector<8x8xf32>
    %cst_35 = arith.constant 0.000000e+00 : f32
    %81 = vector.broadcast %cst_35 : f32 to vector<8x8xf32>
    %82 = arith.maximumf %80, %81 : vector<8x8xf32>
    %83 = vector.shape_cast %82 : vector<8x8xf32> to vector<2x2x2x8xf32>
    %cst_36 = arith.constant dense<0xFF800000> : vector<2x2x8xf32>
    %84 = vector.multi_reduction <maximumf>, %83, %cst_36 [2] : vector<2x2x2x8xf32> to vector<2x2x8xf32>
    %cst_37 = arith.constant 0.000000e+00 : f32
    %85 = vector.broadcast %cst_37 : f32 to vector<2x1x8xf32>
    %86 = tpu.concatenate %85, %84, %85 in 1 : vector<2x1x8xf32>, vector<2x2x8xf32>, vector<2x1x8xf32> -> vector<2x4x8xf32>
    %87 = vector.extract_strided_slice %86 {offsets = [0, 0, 0], sizes = [2, 2, 8], strides = [1, 1, 1]} : vector<2x4x8xf32> to vector<2x2x8xf32>
    %88 = vector.extract_strided_slice %86 {offsets = [0, 1, 0], sizes = [2, 2, 8], strides = [1, 1, 1]} : vector<2x4x8xf32> to vector<2x2x8xf32>
    %89 = vector.extract_strided_slice %86 {offsets = [0, 2, 0], sizes = [2, 2, 8], strides = [1, 1, 1]} : vector<2x4x8xf32> to vector<2x2x8xf32>
    %90 = tpu.concatenate %87, %88, %89 in 2 : vector<2x2x8xf32>, vector<2x2x8xf32>, vector<2x2x8xf32> -> vector<2x2x24xf32>
    %91 = vector.shape_cast %90 : vector<2x2x24xf32> to vector<4x24xf32>
    %c0_38 = arith.constant 0 : index
    %c0_39 = arith.constant 0 : index
    %92 = vector.load %arg10[%c0_38, %c0_39] : memref<24x8xf32, #tpu.memory_space<vmem>>, vector<24x8xf32>
    %cst_40 = arith.constant dense<0.000000e+00> : vector<4x8xf32>
    %93 = tpu.matmul %91, %92, %cst_40 {dimension_numbers = #tpu.dot_dimension_numbers<[1], [0], [0], [1], [0, 0, 1, 1], [], []>} : vector<4x24xf32>, vector<24x8xf32>, vector<4x8xf32> -> vector<4x8xf32>
    %c0_41 = arith.constant 0 : index
    %c0_42 = arith.constant 0 : index
    %94 = vector.load %arg11[%c0_41, %c0_42] : memref<1x8xf32, #tpu.memory_space<vmem>>, vector<1x8xf32>
    %95 = vector.broadcast %94 : vector<1x8xf32> to vector<4x8xf32>
    %96 = arith.addf %93, %95 : vector<4x8xf32>
    %cst_43 = arith.constant dense<0.000000e+00> : vector<4xf32>
    %97 = vector.multi_reduction <add>, %96, %cst_43 [1] : vector<4x8xf32> to vector<4xf32>
    %98 = vector.shape_cast %97 : vector<4xf32> to vector<4x1xf32>
    %cst_44 = arith.constant 8.000000e+00 : f32
    %99 = vector.broadcast %cst_44 : f32 to vector<4x1xf32>
    %100 = arith.divf %98, %99 : vector<4x1xf32>
    %101 = arith.mulf %96, %96 : vector<4x8xf32>
    %cst_45 = arith.constant dense<0.000000e+00> : vector<4xf32>
    %102 = vector.multi_reduction <add>, %101, %cst_45 [1] : vector<4x8xf32> to vector<4xf32>
    %103 = vector.shape_cast %102 : vector<4xf32> to vector<4x1xf32>
    %cst_46 = arith.constant 8.000000e+00 : f32
    %104 = vector.broadcast %cst_46 : f32 to vector<4x1xf32>
    %105 = arith.divf %103, %104 : vector<4x1xf32>
    %106 = arith.mulf %100, %100 : vector<4x1xf32>
    %107 = arith.subf %105, %106 : vector<4x1xf32>
    %cst_47 = arith.constant 0.000000e+00 : f32
    %108 = vector.broadcast %cst_47 : f32 to vector<4x1xf32>
    %109 = arith.maximumf %107, %108 : vector<4x1xf32>
    %110 = vector.broadcast %100 : vector<4x1xf32> to vector<4x8xf32>
    %111 = arith.subf %96, %110 : vector<4x8xf32>
    %cst_48 = arith.constant 9.99999974E-6 : f32
    %112 = vector.broadcast %cst_48 : f32 to vector<4x1xf32>
    %113 = arith.addf %109, %112 : vector<4x1xf32>
    %114 = math.rsqrt %113 : vector<4x1xf32>
    %115 = vector.broadcast %114 : vector<4x1xf32> to vector<4x8xf32>
    %116 = arith.mulf %111, %115 : vector<4x8xf32>
    %c0_49 = arith.constant 0 : index
    %c0_50 = arith.constant 0 : index
    %117 = vector.load %arg12[%c0_49, %c0_50] : memref<1x8xf32, #tpu.memory_space<vmem>>, vector<1x8xf32>
    %118 = vector.broadcast %117 : vector<1x8xf32> to vector<4x8xf32>
    %119 = arith.mulf %116, %118 : vector<4x8xf32>
    %c0_51 = arith.constant 0 : index
    %c0_52 = arith.constant 0 : index
    %120 = vector.load %arg13[%c0_51, %c0_52] : memref<1x8xf32, #tpu.memory_space<vmem>>, vector<1x8xf32>
    %121 = vector.broadcast %120 : vector<1x8xf32> to vector<4x8xf32>
    %122 = arith.addf %119, %121 : vector<4x8xf32>
    %cst_53 = arith.constant 0.000000e+00 : f32
    %123 = vector.broadcast %cst_53 : f32 to vector<4x8xf32>
    %124 = arith.maximumf %122, %123 : vector<4x8xf32>
    %125 = vector.shape_cast %124 : vector<4x8xf32> to vector<2x1x2x8xf32>
    %cst_54 = arith.constant dense<0xFF800000> : vector<2x1x8xf32>
    %126 = vector.multi_reduction <maximumf>, %125, %cst_54 [2] : vector<2x1x2x8xf32> to vector<2x1x8xf32>
    %127 = vector.shape_cast %126 : vector<2x1x8xf32> to vector<2x8xf32>
    %cst_55 = arith.constant 0.000000e+00 : f32
    %128 = vector.broadcast %cst_55 : f32 to vector<2x2x4xf32>
    %129 = tpu.concatenate %128, %0, %128 in 1 : vector<2x2x4xf32>, vector<2x8x4xf32>, vector<2x2x4xf32> -> vector<2x12x4xf32>
    %130 = vector.extract_strided_slice %129 {offsets = [0, 0, 0], sizes = [2, 8, 4], strides = [1, 1, 1]} : vector<2x12x4xf32> to vector<2x8x4xf32>
    %131 = vector.extract_strided_slice %129 {offsets = [0, 1, 0], sizes = [2, 8, 4], strides = [1, 1, 1]} : vector<2x12x4xf32> to vector<2x8x4xf32>
    %132 = vector.extract_strided_slice %129 {offsets = [0, 2, 0], sizes = [2, 8, 4], strides = [1, 1, 1]} : vector<2x12x4xf32> to vector<2x8x4xf32>
    %133 = vector.extract_strided_slice %129 {offsets = [0, 3, 0], sizes = [2, 8, 4], strides = [1, 1, 1]} : vector<2x12x4xf32> to vector<2x8x4xf32>
    %134 = vector.extract_strided_slice %129 {offsets = [0, 4, 0], sizes = [2, 8, 4], strides = [1, 1, 1]} : vector<2x12x4xf32> to vector<2x8x4xf32>
    %135 = tpu.concatenate %130, %131, %132, %133, %134 in 2 : vector<2x8x4xf32>, vector<2x8x4xf32>, vector<2x8x4xf32>, vector<2x8x4xf32>, vector<2x8x4xf32> -> vector<2x8x20xf32>
    %136 = vector.shape_cast %135 : vector<2x8x20xf32> to vector<16x20xf32>
    %c0_56 = arith.constant 0 : index
    %c0_57 = arith.constant 0 : index
    %137 = vector.load %arg14[%c0_56, %c0_57] : memref<20x8xf32, #tpu.memory_space<vmem>>, vector<20x8xf32>
    %cst_58 = arith.constant dense<0.000000e+00> : vector<16x8xf32>
    %138 = tpu.matmul %136, %137, %cst_58 {dimension_numbers = #tpu.dot_dimension_numbers<[1], [0], [0], [1], [0, 0, 1, 1], [], []>} : vector<16x20xf32>, vector<20x8xf32>, vector<16x8xf32> -> vector<16x8xf32>
    %c0_59 = arith.constant 0 : index
    %c0_60 = arith.constant 0 : index
    %139 = vector.load %arg15[%c0_59, %c0_60] : memref<1x8xf32, #tpu.memory_space<vmem>>, vector<1x8xf32>
    %140 = vector.broadcast %139 : vector<1x8xf32> to vector<16x8xf32>
    %141 = arith.addf %138, %140 : vector<16x8xf32>
    %cst_61 = arith.constant dense<0.000000e+00> : vector<16xf32>
    %142 = vector.multi_reduction <add>, %141, %cst_61 [1] : vector<16x8xf32> to vector<16xf32>
    %143 = vector.shape_cast %142 : vector<16xf32> to vector<16x1xf32>
    %cst_62 = arith.constant 8.000000e+00 : f32
    %144 = vector.broadcast %cst_62 : f32 to vector<16x1xf32>
    %145 = arith.divf %143, %144 : vector<16x1xf32>
    %146 = arith.mulf %141, %141 : vector<16x8xf32>
    %cst_63 = arith.constant dense<0.000000e+00> : vector<16xf32>
    %147 = vector.multi_reduction <add>, %146, %cst_63 [1] : vector<16x8xf32> to vector<16xf32>
    %148 = vector.shape_cast %147 : vector<16xf32> to vector<16x1xf32>
    %cst_64 = arith.constant 8.000000e+00 : f32
    %149 = vector.broadcast %cst_64 : f32 to vector<16x1xf32>
    %150 = arith.divf %148, %149 : vector<16x1xf32>
    %151 = arith.mulf %145, %145 : vector<16x1xf32>
    %152 = arith.subf %150, %151 : vector<16x1xf32>
    %cst_65 = arith.constant 0.000000e+00 : f32
    %153 = vector.broadcast %cst_65 : f32 to vector<16x1xf32>
    %154 = arith.maximumf %152, %153 : vector<16x1xf32>
    %155 = vector.broadcast %145 : vector<16x1xf32> to vector<16x8xf32>
    %156 = arith.subf %141, %155 : vector<16x8xf32>
    %cst_66 = arith.constant 9.99999974E-6 : f32
    %157 = vector.broadcast %cst_66 : f32 to vector<16x1xf32>
    %158 = arith.addf %154, %157 : vector<16x1xf32>
    %159 = math.rsqrt %158 : vector<16x1xf32>
    %160 = vector.broadcast %159 : vector<16x1xf32> to vector<16x8xf32>
    %161 = arith.mulf %156, %160 : vector<16x8xf32>
    %c0_67 = arith.constant 0 : index
    %c0_68 = arith.constant 0 : index
    %162 = vector.load %arg16[%c0_67, %c0_68] : memref<1x8xf32, #tpu.memory_space<vmem>>, vector<1x8xf32>
    %163 = vector.broadcast %162 : vector<1x8xf32> to vector<16x8xf32>
    %164 = arith.mulf %161, %163 : vector<16x8xf32>
    %c0_69 = arith.constant 0 : index
    %c0_70 = arith.constant 0 : index
    %165 = vector.load %arg17[%c0_69, %c0_70] : memref<1x8xf32, #tpu.memory_space<vmem>>, vector<1x8xf32>
    %166 = vector.broadcast %165 : vector<1x8xf32> to vector<16x8xf32>
    %167 = arith.addf %164, %166 : vector<16x8xf32>
    %cst_71 = arith.constant 0.000000e+00 : f32
    %168 = vector.broadcast %cst_71 : f32 to vector<16x8xf32>
    %169 = arith.maximumf %167, %168 : vector<16x8xf32>
    %170 = vector.shape_cast %169 : vector<16x8xf32> to vector<2x4x2x8xf32>
    %cst_72 = arith.constant dense<0xFF800000> : vector<2x4x8xf32>
    %171 = vector.multi_reduction <maximumf>, %170, %cst_72 [2] : vector<2x4x2x8xf32> to vector<2x4x8xf32>
    %cst_73 = arith.constant 0.000000e+00 : f32
    %172 = vector.broadcast %cst_73 : f32 to vector<2x2x8xf32>
    %173 = tpu.concatenate %172, %171, %172 in 1 : vector<2x2x8xf32>, vector<2x4x8xf32>, vector<2x2x8xf32> -> vector<2x8x8xf32>
    %174 = vector.extract_strided_slice %173 {offsets = [0, 0, 0], sizes = [2, 4, 8], strides = [1, 1, 1]} : vector<2x8x8xf32> to vector<2x4x8xf32>
    %175 = vector.extract_strided_slice %173 {offsets = [0, 1, 0], sizes = [2, 4, 8], strides = [1, 1, 1]} : vector<2x8x8xf32> to vector<2x4x8xf32>
    %176 = vector.extract_strided_slice %173 {offsets = [0, 2, 0], sizes = [2, 4, 8], strides = [1, 1, 1]} : vector<2x8x8xf32> to vector<2x4x8xf32>
    %177 = vector.extract_strided_slice %173 {offsets = [0, 3, 0], sizes = [2, 4, 8], strides = [1, 1, 1]} : vector<2x8x8xf32> to vector<2x4x8xf32>
    %178 = vector.extract_strided_slice %173 {offsets = [0, 4, 0], sizes = [2, 4, 8], strides = [1, 1, 1]} : vector<2x8x8xf32> to vector<2x4x8xf32>
    %179 = tpu.concatenate %174, %175, %176, %177, %178 in 2 : vector<2x4x8xf32>, vector<2x4x8xf32>, vector<2x4x8xf32>, vector<2x4x8xf32>, vector<2x4x8xf32> -> vector<2x4x40xf32>
    %180 = vector.shape_cast %179 : vector<2x4x40xf32> to vector<8x40xf32>
    %c0_74 = arith.constant 0 : index
    %c0_75 = arith.constant 0 : index
    %181 = vector.load %arg18[%c0_74, %c0_75] : memref<40x8xf32, #tpu.memory_space<vmem>>, vector<40x8xf32>
    %cst_76 = arith.constant dense<0.000000e+00> : vector<8x8xf32>
    %182 = tpu.matmul %180, %181, %cst_76 {dimension_numbers = #tpu.dot_dimension_numbers<[1], [0], [0], [1], [0, 0, 1, 1], [], []>} : vector<8x40xf32>, vector<40x8xf32>, vector<8x8xf32> -> vector<8x8xf32>
    %c0_77 = arith.constant 0 : index
    %c0_78 = arith.constant 0 : index
    %183 = vector.load %arg19[%c0_77, %c0_78] : memref<1x8xf32, #tpu.memory_space<vmem>>, vector<1x8xf32>
    %184 = vector.broadcast %183 : vector<1x8xf32> to vector<8x8xf32>
    %185 = arith.addf %182, %184 : vector<8x8xf32>
    %cst_79 = arith.constant dense<0.000000e+00> : vector<8xf32>
    %186 = vector.multi_reduction <add>, %185, %cst_79 [1] : vector<8x8xf32> to vector<8xf32>
    %187 = vector.shape_cast %186 : vector<8xf32> to vector<8x1xf32>
    %cst_80 = arith.constant 8.000000e+00 : f32
    %188 = vector.broadcast %cst_80 : f32 to vector<8x1xf32>
    %189 = arith.divf %187, %188 : vector<8x1xf32>
    %190 = arith.mulf %185, %185 : vector<8x8xf32>
    %cst_81 = arith.constant dense<0.000000e+00> : vector<8xf32>
    %191 = vector.multi_reduction <add>, %190, %cst_81 [1] : vector<8x8xf32> to vector<8xf32>
    %192 = vector.shape_cast %191 : vector<8xf32> to vector<8x1xf32>
    %cst_82 = arith.constant 8.000000e+00 : f32
    %193 = vector.broadcast %cst_82 : f32 to vector<8x1xf32>
    %194 = arith.divf %192, %193 : vector<8x1xf32>
    %195 = arith.mulf %189, %189 : vector<8x1xf32>
    %196 = arith.subf %194, %195 : vector<8x1xf32>
    %cst_83 = arith.constant 0.000000e+00 : f32
    %197 = vector.broadcast %cst_83 : f32 to vector<8x1xf32>
    %198 = arith.maximumf %196, %197 : vector<8x1xf32>
    %199 = vector.broadcast %189 : vector<8x1xf32> to vector<8x8xf32>
    %200 = arith.subf %185, %199 : vector<8x8xf32>
    %cst_84 = arith.constant 9.99999974E-6 : f32
    %201 = vector.broadcast %cst_84 : f32 to vector<8x1xf32>
    %202 = arith.addf %198, %201 : vector<8x1xf32>
    %203 = math.rsqrt %202 : vector<8x1xf32>
    %204 = vector.broadcast %203 : vector<8x1xf32> to vector<8x8xf32>
    %205 = arith.mulf %200, %204 : vector<8x8xf32>
    %c0_85 = arith.constant 0 : index
    %c0_86 = arith.constant 0 : index
    %206 = vector.load %arg20[%c0_85, %c0_86] : memref<1x8xf32, #tpu.memory_space<vmem>>, vector<1x8xf32>
    %207 = vector.broadcast %206 : vector<1x8xf32> to vector<8x8xf32>
    %208 = arith.mulf %205, %207 : vector<8x8xf32>
    %c0_87 = arith.constant 0 : index
    %c0_88 = arith.constant 0 : index
    %209 = vector.load %arg21[%c0_87, %c0_88] : memref<1x8xf32, #tpu.memory_space<vmem>>, vector<1x8xf32>
    %210 = vector.broadcast %209 : vector<1x8xf32> to vector<8x8xf32>
    %211 = arith.addf %208, %210 : vector<8x8xf32>
    %cst_89 = arith.constant 0.000000e+00 : f32
    %212 = vector.broadcast %cst_89 : f32 to vector<8x8xf32>
    %213 = arith.maximumf %211, %212 : vector<8x8xf32>
    %214 = vector.shape_cast %213 : vector<8x8xf32> to vector<2x2x2x8xf32>
    %cst_90 = arith.constant dense<0xFF800000> : vector<2x2x8xf32>
    %215 = vector.multi_reduction <maximumf>, %214, %cst_90 [2] : vector<2x2x2x8xf32> to vector<2x2x8xf32>
    %cst_91 = arith.constant 0.000000e+00 : f32
    %216 = vector.broadcast %cst_91 : f32 to vector<2x2x8xf32>
    %217 = tpu.concatenate %216, %215, %216 in 1 : vector<2x2x8xf32>, vector<2x2x8xf32>, vector<2x2x8xf32> -> vector<2x6x8xf32>
    %218 = vector.extract_strided_slice %217 {offsets = [0, 0, 0], sizes = [2, 2, 8], strides = [1, 1, 1]} : vector<2x6x8xf32> to vector<2x2x8xf32>
    %219 = vector.extract_strided_slice %217 {offsets = [0, 1, 0], sizes = [2, 2, 8], strides = [1, 1, 1]} : vector<2x6x8xf32> to vector<2x2x8xf32>
    %220 = vector.extract_strided_slice %217 {offsets = [0, 2, 0], sizes = [2, 2, 8], strides = [1, 1, 1]} : vector<2x6x8xf32> to vector<2x2x8xf32>
    %221 = vector.extract_strided_slice %217 {offsets = [0, 3, 0], sizes = [2, 2, 8], strides = [1, 1, 1]} : vector<2x6x8xf32> to vector<2x2x8xf32>
    %222 = vector.extract_strided_slice %217 {offsets = [0, 4, 0], sizes = [2, 2, 8], strides = [1, 1, 1]} : vector<2x6x8xf32> to vector<2x2x8xf32>
    %223 = tpu.concatenate %218, %219, %220, %221, %222 in 2 : vector<2x2x8xf32>, vector<2x2x8xf32>, vector<2x2x8xf32>, vector<2x2x8xf32>, vector<2x2x8xf32> -> vector<2x2x40xf32>
    %224 = vector.shape_cast %223 : vector<2x2x40xf32> to vector<4x40xf32>
    %c0_92 = arith.constant 0 : index
    %c0_93 = arith.constant 0 : index
    %225 = vector.load %arg22[%c0_92, %c0_93] : memref<40x8xf32, #tpu.memory_space<vmem>>, vector<40x8xf32>
    %cst_94 = arith.constant dense<0.000000e+00> : vector<4x8xf32>
    %226 = tpu.matmul %224, %225, %cst_94 {dimension_numbers = #tpu.dot_dimension_numbers<[1], [0], [0], [1], [0, 0, 1, 1], [], []>} : vector<4x40xf32>, vector<40x8xf32>, vector<4x8xf32> -> vector<4x8xf32>
    %c0_95 = arith.constant 0 : index
    %c0_96 = arith.constant 0 : index
    %227 = vector.load %arg23[%c0_95, %c0_96] : memref<1x8xf32, #tpu.memory_space<vmem>>, vector<1x8xf32>
    %228 = vector.broadcast %227 : vector<1x8xf32> to vector<4x8xf32>
    %229 = arith.addf %226, %228 : vector<4x8xf32>
    %cst_97 = arith.constant dense<0.000000e+00> : vector<4xf32>
    %230 = vector.multi_reduction <add>, %229, %cst_97 [1] : vector<4x8xf32> to vector<4xf32>
    %231 = vector.shape_cast %230 : vector<4xf32> to vector<4x1xf32>
    %cst_98 = arith.constant 8.000000e+00 : f32
    %232 = vector.broadcast %cst_98 : f32 to vector<4x1xf32>
    %233 = arith.divf %231, %232 : vector<4x1xf32>
    %234 = arith.mulf %229, %229 : vector<4x8xf32>
    %cst_99 = arith.constant dense<0.000000e+00> : vector<4xf32>
    %235 = vector.multi_reduction <add>, %234, %cst_99 [1] : vector<4x8xf32> to vector<4xf32>
    %236 = vector.shape_cast %235 : vector<4xf32> to vector<4x1xf32>
    %cst_100 = arith.constant 8.000000e+00 : f32
    %237 = vector.broadcast %cst_100 : f32 to vector<4x1xf32>
    %238 = arith.divf %236, %237 : vector<4x1xf32>
    %239 = arith.mulf %233, %233 : vector<4x1xf32>
    %240 = arith.subf %238, %239 : vector<4x1xf32>
    %cst_101 = arith.constant 0.000000e+00 : f32
    %241 = vector.broadcast %cst_101 : f32 to vector<4x1xf32>
    %242 = arith.maximumf %240, %241 : vector<4x1xf32>
    %243 = vector.broadcast %233 : vector<4x1xf32> to vector<4x8xf32>
    %244 = arith.subf %229, %243 : vector<4x8xf32>
    %cst_102 = arith.constant 9.99999974E-6 : f32
    %245 = vector.broadcast %cst_102 : f32 to vector<4x1xf32>
    %246 = arith.addf %242, %245 : vector<4x1xf32>
    %247 = math.rsqrt %246 : vector<4x1xf32>
    %248 = vector.broadcast %247 : vector<4x1xf32> to vector<4x8xf32>
    %249 = arith.mulf %244, %248 : vector<4x8xf32>
    %c0_103 = arith.constant 0 : index
    %c0_104 = arith.constant 0 : index
    %250 = vector.load %arg24[%c0_103, %c0_104] : memref<1x8xf32, #tpu.memory_space<vmem>>, vector<1x8xf32>
    %251 = vector.broadcast %250 : vector<1x8xf32> to vector<4x8xf32>
    %252 = arith.mulf %249, %251 : vector<4x8xf32>
    %c0_105 = arith.constant 0 : index
    %c0_106 = arith.constant 0 : index
    %253 = vector.load %arg25[%c0_105, %c0_106] : memref<1x8xf32, #tpu.memory_space<vmem>>, vector<1x8xf32>
    %254 = vector.broadcast %253 : vector<1x8xf32> to vector<4x8xf32>
    %255 = arith.addf %252, %254 : vector<4x8xf32>
    %cst_107 = arith.constant 0.000000e+00 : f32
    %256 = vector.broadcast %cst_107 : f32 to vector<4x8xf32>
    %257 = arith.maximumf %255, %256 : vector<4x8xf32>
    %258 = vector.shape_cast %257 : vector<4x8xf32> to vector<2x1x2x8xf32>
    %cst_108 = arith.constant dense<0xFF800000> : vector<2x1x8xf32>
    %259 = vector.multi_reduction <maximumf>, %258, %cst_108 [2] : vector<2x1x2x8xf32> to vector<2x1x8xf32>
    %260 = vector.shape_cast %259 : vector<2x1x8xf32> to vector<2x8xf32>
    %261 = tpu.concatenate %127, %260 in 1 : vector<2x8xf32>, vector<2x8xf32> -> vector<2x16xf32>
    %c0_109 = arith.constant 0 : index
    %c0_110 = arith.constant 0 : index
    %262 = vector.load %arg26[%c0_109, %c0_110] : memref<16x16xf32, #tpu.memory_space<vmem>>, vector<16x16xf32>
    %cst_111 = arith.constant dense<0.000000e+00> : vector<2x16xf32>
    %263 = tpu.matmul %261, %262, %cst_111 {dimension_numbers = #tpu.dot_dimension_numbers<[1], [0], [0], [1], [0, 0, 1, 1], [], []>} : vector<2x16xf32>, vector<16x16xf32>, vector<2x16xf32> -> vector<2x16xf32>
    %c0_112 = arith.constant 0 : index
    %c0_113 = arith.constant 0 : index
    %264 = vector.load %arg27[%c0_112, %c0_113] : memref<1x16xf32, #tpu.memory_space<vmem>>, vector<1x16xf32>
    %265 = vector.broadcast %264 : vector<1x16xf32> to vector<2x16xf32>
    %266 = arith.addf %263, %265 : vector<2x16xf32>
    %c0_114 = arith.constant 0 : index
    %c0_115 = arith.constant 0 : index
    %267 = vector.load %arg28[%c0_114, %c0_115] : memref<2x16xf32, #tpu.memory_space<vmem>>, vector<2x16xf32>
    tpu.vector_store %arg28[%c0_114, %c0_115], %266 {strides = array<i32>} : memref<2x16xf32, #tpu.memory_space<vmem>>, vector<2x16xf32>,
    return
  }
  func.func @transform_0(%arg0: i32) -> (i32, i32, i32) {
    %c0_i32 = arith.constant 0 : i32
    %c0_i32_0 = arith.constant 0 : i32
    %c0_i32_1 = arith.constant 0 : i32
    return %arg0, %c0_i32, %c0_i32_0 : i32, i32, i32
  }
  func.func @transform_1(%arg0: i32) -> (i32, i32) {
    %c0_i32 = arith.constant 0 : i32
    %c0_i32_0 = arith.constant 0 : i32
    %c0_i32_1 = arith.constant 0 : i32
    return %c0_i32, %c0_i32_0 : i32, i32
  }
  func.func @transform_2(%arg0: i32) -> (i32, i32) {
    %c0_i32 = arith.constant 0 : i32
    %c0_i32_0 = arith.constant 0 : i32
    %c0_i32_1 = arith.constant 0 : i32
    return %c0_i32, %c0_i32_0 : i32, i32
  }
  func.func @transform_3(%arg0: i32) -> (i32, i32) {
    %c0_i32 = arith.constant 0 : i32
    %c0_i32_0 = arith.constant 0 : i32
    %c0_i32_1 = arith.constant 0 : i32
    return %c0_i32, %c0_i32_0 : i32, i32
  }
  func.func @transform_4(%arg0: i32) -> (i32, i32) {
    %c0_i32 = arith.constant 0 : i32
    %c0_i32_0 = arith.constant 0 : i32
    %c0_i32_1 = arith.constant 0 : i32
    return %c0_i32, %c0_i32_0 : i32, i32
  }
  func.func @transform_5(%arg0: i32) -> (i32, i32) {
    %c0_i32 = arith.constant 0 : i32
    %c0_i32_0 = arith.constant 0 : i32
    %c0_i32_1 = arith.constant 0 : i32
    return %c0_i32, %c0_i32_0 : i32, i32
  }
  func.func @transform_6(%arg0: i32) -> (i32, i32) {
    %c0_i32 = arith.constant 0 : i32
    %c0_i32_0 = arith.constant 0 : i32
    %c0_i32_1 = arith.constant 0 : i32
    return %c0_i32, %c0_i32_0 : i32, i32
  }
  func.func @transform_7(%arg0: i32) -> (i32, i32) {
    %c0_i32 = arith.constant 0 : i32
    %c0_i32_0 = arith.constant 0 : i32
    %c0_i32_1 = arith.constant 0 : i32
    return %c0_i32, %c0_i32_0 : i32, i32
  }
  func.func @transform_8(%arg0: i32) -> (i32, i32) {
    %c0_i32 = arith.constant 0 : i32
    %c0_i32_0 = arith.constant 0 : i32
    %c0_i32_1 = arith.constant 0 : i32
    return %c0_i32, %c0_i32_0 : i32, i32
  }
  func.func @transform_9(%arg0: i32) -> (i32, i32) {
    %c0_i32 = arith.constant 0 : i32
    %c0_i32_0 = arith.constant 0 : i32
    %c0_i32_1 = arith.constant 0 : i32
    return %c0_i32, %c0_i32_0 : i32, i32
  }
  func.func @transform_10(%arg0: i32) -> (i32, i32) {
    %c0_i32 = arith.constant 0 : i32
    %c0_i32_0 = arith.constant 0 : i32
    %c0_i32_1 = arith.constant 0 : i32
    return %c0_i32, %c0_i32_0 : i32, i32
  }
  func.func @transform_11(%arg0: i32) -> (i32, i32) {
    %c0_i32 = arith.constant 0 : i32
    %c0_i32_0 = arith.constant 0 : i32
    %c0_i32_1 = arith.constant 0 : i32
    return %c0_i32, %c0_i32_0 : i32, i32
  }
  func.func @transform_12(%arg0: i32) -> (i32, i32) {
    %c0_i32 = arith.constant 0 : i32
    %c0_i32_0 = arith.constant 0 : i32
    %c0_i32_1 = arith.constant 0 : i32
    return %c0_i32, %c0_i32_0 : i32, i32
  }
  func.func @transform_13(%arg0: i32) -> (i32, i32) {
    %c0_i32 = arith.constant 0 : i32
    %c0_i32_0 = arith.constant 0 : i32
    %c0_i32_1 = arith.constant 0 : i32
    return %c0_i32, %c0_i32_0 : i32, i32
  }
  func.func @transform_14(%arg0: i32) -> (i32, i32) {
    %c0_i32 = arith.constant 0 : i32
    %c0_i32_0 = arith.constant 0 : i32
    %c0_i32_1 = arith.constant 0 : i32
    return %c0_i32, %c0_i32_0 : i32, i32
  }
  func.func @transform_15(%arg0: i32) -> (i32, i32) {
    %c0_i32 = arith.constant 0 : i32
    %c0_i32_0 = arith.constant 0 : i32
    %c0_i32_1 = arith.constant 0 : i32
    return %c0_i32, %c0_i32_0 : i32, i32
  }
  func.func @transform_16(%arg0: i32) -> (i32, i32) {
    %c0_i32 = arith.constant 0 : i32
    %c0_i32_0 = arith.constant 0 : i32
    %c0_i32_1 = arith.constant 0 : i32
    return %c0_i32, %c0_i32_0 : i32, i32
  }
  func.func @transform_17(%arg0: i32) -> (i32, i32) {
    %c0_i32 = arith.constant 0 : i32
    %c0_i32_0 = arith.constant 0 : i32
    %c0_i32_1 = arith.constant 0 : i32
    return %c0_i32, %c0_i32_0 : i32, i32
  }
  func.func @transform_18(%arg0: i32) -> (i32, i32) {
    %c0_i32 = arith.constant 0 : i32
    %c0_i32_0 = arith.constant 0 : i32
    %c0_i32_1 = arith.constant 0 : i32
    return %c0_i32, %c0_i32_0 : i32, i32
  }
  func.func @transform_19(%arg0: i32) -> (i32, i32) {
    %c0_i32 = arith.constant 0 : i32
    %c0_i32_0 = arith.constant 0 : i32
    %c0_i32_1 = arith.constant 0 : i32
    return %c0_i32, %c0_i32_0 : i32, i32
  }
  func.func @transform_20(%arg0: i32) -> (i32, i32) {
    %c0_i32 = arith.constant 0 : i32
    %c0_i32_0 = arith.constant 0 : i32
    %c0_i32_1 = arith.constant 0 : i32
    return %c0_i32, %c0_i32_0 : i32, i32
  }
  func.func @transform_21(%arg0: i32) -> (i32, i32) {
    %c0_i32 = arith.constant 0 : i32
    %c0_i32_0 = arith.constant 0 : i32
    %c0_i32_1 = arith.constant 0 : i32
    return %c0_i32, %c0_i32_0 : i32, i32
  }
  func.func @transform_22(%arg0: i32) -> (i32, i32) {
    %c0_i32 = arith.constant 0 : i32
    %c0_i32_0 = arith.constant 0 : i32
    %c0_i32_1 = arith.constant 0 : i32
    return %c0_i32, %c0_i32_0 : i32, i32
  }
  func.func @transform_23(%arg0: i32) -> (i32, i32) {
    %c0_i32 = arith.constant 0 : i32
    %c0_i32_0 = arith.constant 0 : i32
    %c0_i32_1 = arith.constant 0 : i32
    return %c0_i32, %c0_i32_0 : i32, i32
  }
  func.func @transform_24(%arg0: i32) -> (i32, i32) {
    %c0_i32 = arith.constant 0 : i32
    %c0_i32_0 = arith.constant 0 : i32
    %c0_i32_1 = arith.constant 0 : i32
    return %c0_i32, %c0_i32_0 : i32, i32
  }
  func.func @transform_25(%arg0: i32) -> (i32, i32) {
    %c0_i32 = arith.constant 0 : i32
    %c0_i32_0 = arith.constant 0 : i32
    %c0_i32_1 = arith.constant 0 : i32
    return %c0_i32, %c0_i32_0 : i32, i32
  }
  func.func @transform_26(%arg0: i32) -> (i32, i32) {
    %c0_i32 = arith.constant 0 : i32
    %c0_i32_0 = arith.constant 0 : i32
    %c0_i32_1 = arith.constant 0 : i32
    return %c0_i32, %c0_i32_0 : i32, i32
  }
  func.func @transform_27(%arg0: i32) -> (i32, i32) {
    %c0_i32 = arith.constant 0 : i32
    %c0_i32_0 = arith.constant 0 : i32
    return %arg0, %c0_i32 : i32, i32
  }
}

</mosaic_0001>

<bundles_post_ra>
// kernel: tpu_custom_call.1
= control target key start
LH: loop header
LB: loop body
LE: loop exit
PB: predicated region body
PF: predicated region fallthrough
CT: control target
= control target key end

     0   :  { %s1863_s0 = inlined_call_operand.vmem [shape: f32[2,8,4], index: 0, kind: input, shape index: {}]   ;;  %s1864_s1 = inlined_call_operand.vmem [shape: f32[12,8], index: 1, kind: input, shape index: {}]   ;;  %s1865_s2 = inlined_call_operand.vmem [shape: f32[1,8], index: 2, kind: input, shape index: {}]   ;;  %s1866_s3 = inlined_call_operand.vmem [shape: f32[1,8], index: 3, kind: input, shape index: {}]   ;;  %s1867_s4 = inlined_call_operand.vmem [shape: f32[1,8], index: 4, kind: input, shape index: {}]   ;;  %s1868_s5 = inlined_call_operand.vmem [shape: f32[24,8], index: 5, kind: input, shape index: {}]   ;;  %s1869_s6 = inlined_call_operand.vmem [shape: f32[1,8], index: 6, kind: input, shape index: {}]   ;;  %s1870_s7 = inlined_call_operand.vmem [shape: f32[1,8], index: 7, kind: input, shape index: {}]   ;;  %s1871_s8 = inlined_call_operand.vmem [shape: f32[1,8], index: 8, kind: input, shape index: {}]   ;;  %s1872_s9 = inlined_call_operand.vmem [shape: f32[24,8], index: 9, kind: input, shape index: {}]   ;;  %s1873_s10 = inlined_call_operand.vmem [shape: f32[1,8], index: 10, kind: input, shape index: {}]   ;;  %s1874_s11 = inlined_call_operand.vmem [shape: f32[1,8], index: 11, kind: input, shape index: {}]   ;;  %s1875_s12 = inlined_call_operand.vmem [shape: f32[1,8], index: 12, kind: input, shape index: {}]   ;;  %s1876_s13 = inlined_call_operand.vmem [shape: f32[20,8], index: 13, kind: input, shape index: {}]   ;;  %s1877_s14 = inlined_call_operand.vmem [shape: f32[1,8], index: 14, kind: input, shape index: {}]   ;;  %s1878_s15 = inlined_call_operand.vmem [shape: f32[1,8], index: 15, kind: input, shape index: {}]   ;;  %s1879_s16 = inlined_call_operand.vmem [shape: f32[1,8], index: 16, kind: input, shape index: {}]   ;;  %s1880_s17 = inlined_call_operand.vmem [shape: f32[40,8], index: 17, kind: input, shape index: {}]   ;;  %s1881_s18 = inlined_call_operand.vmem [shape: f32[1,8], index: 18, kind: input, shape index: {}]   ;;  %s1882_s19 = inlined_call_operand.vmem [shape: f32[1,8], index: 19, kind: input, shape index: {}]   ;;  %s1883_s20 = inlined_call_operand.vmem [shape: f32[1,8], index: 20, kind: input, shape index: {}]   ;;  %s1884_s21 = inlined_call_operand.vmem [shape: f32[40,8], index: 21, kind: input, shape index: {}]   ;;  %s1885_s22 = inlined_call_operand.vmem [shape: f32[1,8], index: 22, kind: input, shape index: {}]   ;;  %s1886_s23 = inlined_call_operand.vmem [shape: f32[1,8], index: 23, kind: input, shape index: {}]   ;;  %s1887_s24 = inlined_call_operand.vmem [shape: f32[1,8], index: 24, kind: input, shape index: {}]   ;;  %s1888_s25 = inlined_call_operand.vmem [shape: f32[16,16], index: 25, kind: input, shape index: {}]   ;;  %s1889_s26 = inlined_call_operand.vmem [shape: f32[1,16], index: 26, kind: input, shape index: {}]   ;;  %s1890_s27 = inlined_call_operand.hbm [shape: f32[2,16], index: 27, kind: output, shape index: {}]  }
   0x1   :  { %1896 = sst [smem:[#allocation5_spill]] %s1863_s0 }
   0x2   :  { %1897 = sst [smem:[#allocation6_spill]] %s1864_s1 }
   0x3   :  { %1898 = sst [smem:[#allocation7_spill]] %s1865_s2 }
   0x4   :  { %1899 = sst [smem:[#allocation8_spill]] %s1866_s3 }
   0x5   :  { %1900 = sst [smem:[#allocation9_spill]] %s1867_s4 }
   0x6   :  { %1901 = sst [smem:[#allocation10_spill]] %s1868_s5 }
   0x7   :  { %1902 = sst [smem:[#allocation11_spill]] %s1869_s6 }
   0x8   :  { %1903 = sst [smem:[#allocation12_spill]] %s1870_s7 }
   0x9   :  { %1904 = sst [smem:[#allocation13_spill]] %s1871_s8 }
   0xa   :  { %1905 = sst [smem:[#allocation14_spill]] %s1872_s9 }
   0xb   :  { %1906 = sst [smem:[#allocation15_spill]] %s1873_s10 }
   0xc   :  { %1907 = sst [smem:[#allocation16_spill]] %s1874_s11 }
   0xd   :  { %s1908_s8 = sld [smem:[#allocation5_spill]]  ;;  %vm95_vm0 = vcmask 1040384   ;;  %vm104_vm1 = vcmask 1046528   ;;  %vm117_vm2 = vcmask 1045504   ;;  %s1297_s5 = smov 4  }
  0x13   :  { %v1448_v0 = vld [vmem:[%s1908_s8] sm:$0xff]  ;;  %v1453_v1 = vld [vmem:[%s1908_s8 + $0x8] sm:$0xff] }
  0x14   :  { %v91_v2 = vrot.slane %v1448_v0, 7  ;;  %v92_v3 = vrot.slane %v1453_v1, 7 }
  0x16   :  { %v96_v4 = vsel %vm95_vm0, 0.0, %v91_v2  ;;  %v98_v5 = vsel %vm95_vm0, %v91_v2, 0.0  ;;  %v97_v6 = vsel %vm95_vm0, 0.0, %v92_v3  ;;  %v99_v9 = vsel %vm95_vm0, %v92_v3, 0.0 }
  0x17   :  { %v105_v7 = vrot.slane %v96_v4, 1  ;;  %v106_v8 = vrot.slane %v98_v5, 1  ;;  %v108_v10 = vrot.slane %v97_v6, 1  ;;  %v109_v11 = vrot.slane %v99_v9, 1 }
  0x18   :  { %v118_v12 = vrot.slane %v96_v4, 2  ;;  %v119_v13 = vrot.slane %v98_v5, 2  ;;  %v121_v15 = vrot.slane %v97_v6, 2  ;;  %v122_v16 = vrot.slane %v99_v9, 2 }
  0x19   :  { %v107_v14 = vsel %vm104_vm1, %v105_v7, %v106_v8  ;;  %v110_v17 = vsel %vm104_vm1, %v108_v10, %v109_v11 }
  0x1a   :  { %111 = vrot.lane.b32.xlu0 %v107_v14, %s1297_s5  ;;  %113 = vrot.lane.b32.xlu1 %v110_v17, %s1297_s5 }
  0x1b   :  { %32 = vsyncpa [#allocation3], 0  ;;  %v120_v18 = vsel %vm117_vm2, %v118_v12, %v119_v13  ;;  %v123_v19 = vsel %vm117_vm2, %v121_v15, %v122_v16  ;;  %s1298_s28 = smov 8   ;;  %s1909_s29 = sld [smem:[#allocation6_spill]]  ;;  %vm1895_vm3 = vcmask 1043456   ;;  %vm130_vm4 = vcmask 31744  }
  0x1c   :  { %vm133_vm5 = vcmask 64512   ;;  %vm142_vm6 = vcmask 97280   ;;  %s1910_s3 = sld [smem:[#allocation7_spill]]  ;;  %v596_v41 = vrot.slane %v1448_v0, 6  ;;  %vm600_vm7 = vcmask 1041408   ;;  %s1299_s7 = smov 12  }
  0x1d   :  { %vm339_vm8 = vcmask 1044480   ;;  %s1300_s4 = smov 16   ;;  %v1301_v56 = vmov 8.0   ;;  %v597_v5 = vrot.slane %v1453_v1, 6  ;;  %v667_v7 = vld [vmem:[%s1876_s13 + $0x10] sm:$0xf] }
  0x1e   :  { %v1501_v42 = vsel %vm600_vm7, 0.0, %v596_v41  ;;  %v603_v43 = vsel %vm600_vm7, %v596_v41, 0.0  ;;  %1253 = vrcp.f32 %v1301_v56  ;;  %1220 = vmatpush.msk.msra.mxu3 %vm1895_vm3, %v667_v7  ;;  %v666_v9 = vld [vmem:[%s1876_s13 + $0x8] sm:$0xff]  ;;  %v665_v13 = vld [vmem:[%s1876_s13] sm:$0xff]  ;;  %s1911_s6 = sld [smem:[#allocation8_spill]]  ;;  %vm261_vm14 = vcmask 58368  }
  0x1f   :  { %v609_v44 = vrot.slane %v1501_v42, 1  ;;  %v610_v45 = vrot.slane %v603_v43, 1  ;;  %v621_v47 = vrot.slane %v1501_v42, 2  ;;  %v622_v48 = vrot.slane %v603_v43, 2  ;;  %s1912_s2 = sld [smem:[#allocation9_spill]] }
  0x20   :  { %v633_v50 = vrot.slane %v1501_v42, 3  ;;  %v634_v51 = vrot.slane %v603_v43, 3  ;;  %v645_v53 = vrot.slane %v1501_v42, 4  ;;  %v646_v54 = vrot.slane %v603_v43, 4  ;;  %696 = vmatpush.msra.mxu3 %v666_v9  ;;  %s1913_s30 = sld [smem:[#allocation10_spill]] }
  0x21   :  { %v137_v20 = vld [vmem:[%s1909_s29 + $0x8] sm:$0xf]  ;;  %v136_v21 = vld [vmem:[%s1909_s29] sm:$0xff]  ;;  %v611_v46 = vsel %vm104_vm1, %v609_v44, %v610_v45  ;;  %v623_v49 = vsel %vm117_vm2, %v621_v47, %v622_v48  ;;  %v1529_v11 = vsel %vm600_vm7, 0.0, %v597_v5  ;;  %v1537_v17 = vsel %vm600_vm7, %v597_v5, 0.0  ;;  %s1920_s11 = sld [smem:[#allocation15_spill]] }
  0x22   :  { %124 = vrot.lane.b32.xlu0 %v120_v18, %s1298_s28  ;;  %126 = vrot.lane.b32.xlu1 %v123_v19, %s1298_s28  ;;  %v1234_v30 = vld [vmem:[%s1910_s3] ss:$0 sm:$0xff]  ;;  %v635_v52 = vsel %vm339_vm8, %v633_v50, %v634_v51  ;;  %v647_v55 = vsel %vm1895_vm3, %v645_v53, %v646_v54  ;;  %v612_v18 = vrot.slane %v1529_v11, 1  ;;  %v613_v19 = vrot.slane %v1537_v17, 1  ;;  %s1206_s3 = sshll.u32 %s1890_s27, 4  ;;  %s1207_s3 = int_to_ptr.hbm [resolvable:$true] %s1206_s3 }
  0x23   :  { %1215 = vmatpush.msk.msra.mxu0 %vm1895_vm3, %v137_v20  ;;  %697 = vmatpush.msra.mxu3 %v665_v13 }
  0x24   :  { %v1254_v57 = vpop.eup %1253 }
  0x25   :  { %168 = vmatpush.msra.mxu0 %v136_v21  ;;  %v183_v58 = vmul.f32 8.0, %v1254_v57  ;;  %vm187_vm9 = vweird.f32 %v1254_v57  ;;  %v614_v21 = vsel %vm104_vm1, %v612_v18, %v613_v19 }
  0x27   :  { %v184_v59 = vsub.f32 1.0, %v183_v58 }
  0x29   :  { %v185_v60 = vmul.f32 %v1254_v57, %v184_v59 }
  0x2b   :  { %v186_v61 = vadd.f32 %v1254_v57, %v185_v60 }
  0x2d   :  { %v1516_v62 = vsel %vm187_vm9, %v1254_v57, %v186_v61  ;;  %vm362_vm9 = vcmask 130048  }
  0x8c   :  { %v112_v22 = vpop.permute.xlu0 %111  ;;  %v114_v23 = vpop.permute.xlu1 %113 }
  0x8d   :  { %v131_v24 = vsel %vm130_vm4, %v96_v4, %v112_v22  ;;  %v132_v27 = vsel %vm130_vm4, %v97_v6, %v114_v23 }
  0x94   :  { %v125_v25 = vpop.permute.xlu0 %124  ;;  %v127_v28 = vpop.permute.xlu1 %126 }
  0x95   :  { %v134_v26 = vsel %vm133_vm5, %v131_v24, %v125_v25  ;;  %v135_v29 = vsel %vm133_vm5, %v132_v27, %v127_v28 }
  0x96   :  { %1216 = vmatmul.msk.f32.vlgmr.msra.gmra.mxu0 %vm142_vm6, %v134_v26 }
  0x9e   :  { %1217 = vmatmul.msk.f32.gmra.mxu0 %vm142_vm6, %v135_v29 }
 0x113   :  { %v170_v31 = vpop.f32.mrf.mxu0 }
 0x114   :  { %v1485_v32 = vadd.f32 %v1234_v30, %v170_v31 }
 0x116   :  { %v176_v33 = vsel %vm133_vm5, %v1485_v32, 0.0  ;;  %v191_v34 = vmul.f32 %v1485_v32, %v1485_v32 }
 0x117   :  { %177 = vadd.xlane.f32.xlu2 %v176_v33 }
 0x118   :  { %v193_v35 = vsel %vm133_vm5, %v191_v34, 0.0 }
 0x119   :  { %194 = vadd.xlane.f32.xlu0 %v193_v35  ;;  %v1235_v35 = vld [vmem:[%s1911_s6] ss:$0 sm:$0xff]  ;;  %s1914_s6 = sld [smem:[#allocation11_spill]] }
 0x11b   :  { %v173_v36 = vpop.f32.mrf.mxu0 }
 0x11c   :  { %v1492_v37 = vadd.f32 %v1234_v30, %v173_v36 }
 0x11e   :  { %v179_v38 = vsel %vm133_vm5, %v1492_v37, 0.0  ;;  %v192_v39 = vmul.f32 %v1492_v37, %v1492_v37 }
 0x11f   :  { %180 = vadd.xlane.f32.xlu2 %v179_v38 }
 0x120   :  { %v196_v40 = vsel %vm133_vm5, %v192_v39, 0.0  ;;  %v1236_v39 = vld [vmem:[%s1912_s2] ss:$0 sm:$0xff]  ;;  %s1915_s2 = sld [smem:[#allocation12_spill]] }
 0x121   :  { %197 = vadd.xlane.f32.xlu1 %v196_v40 }
 0x12d   :  { %617 = vrot.lane.b32.xlu0 %v614_v21, %s1297_s5 }
 0x137   :  { %615 = vrot.lane.b32.xlu2 %v611_v46, %s1297_s5 }
 0x13f   :  { %627 = vrot.lane.b32.xlu2 %v623_v49, %s1298_s28 }
 0x147   :  { %639 = vrot.lane.b32.xlu2 %v635_v52, %s1299_s7 }
 0x14f   :  { %651 = vrot.lane.b32.xlu2 %v647_v55, %s1300_s4 }
 0x18a   :  { %v178_v63 = vpop.xlane.xlu2 %177 }
 0x18b   :  { %v189_v0 = vmul.f32 %v1516_v62, %v178_v63 }
 0x18c   :  { %v195_v2 = vpop.xlane.xlu0 %194 }
 0x18d   :  { %v201_v3 = vmul.f32 %v189_v0, %v189_v0  ;;  %v199_v4 = vmul.f32 %v195_v2, %v1516_v62  ;;  %v207_v34 = vsub.f32 %v1485_v32, %v189_v0 }
 0x18f   :  { %v203_v6 = vsub.f32 %v199_v4, %v201_v3 }
 0x191   :  { %v205_v8 = vmax.f32 %v203_v6, 0.0 }
 0x192   :  { %v181_v10 = vpop.xlane.xlu2 %180 }
 0x193   :  { %v209_v12 = vadd.f32 1e-05, %v205_v8  ;;  %v190_v1 = vmul.f32 %v1516_v62, %v181_v10 }
 0x194   :  { %v198_v14 = vpop.xlane.xlu1 %197 }
 0x195   :  { %1255 = vrsqrt.f32 %v209_v12  ;;  %v202_v15 = vmul.f32 %v190_v1, %v190_v1  ;;  %v200_v16 = vmul.f32 %v198_v14, %v1516_v62  ;;  %vm217_vm11 = vweird.f32 %v209_v12 }
 0x196   :  { %v208_v51 = vsub.f32 %v1492_v37, %v190_v1 }
 0x197   :  { %v204_v20 = vsub.f32 %v200_v16, %v202_v15 }
 0x199   :  { %v206_v22 = vmax.f32 %v204_v20, 0.0 }
 0x19a   :  { %v616_v23 = vpop.permute.xlu2 %615 }
 0x19b   :  { %v1256_v24 = vpop.eup %1255  ;;  %v210_v26 = vadd.f32 1e-05, %v206_v22  ;;  %v657_v45 = vsel %vm130_vm4, %v1501_v42, %v616_v23 }
 0x19c   :  { %v212_v25 = vmul.f32 %v1256_v24, %v209_v12  ;;  %vm218_vm10 = vweird.f32 %v1256_v24 }
 0x19d   :  { %1257 = vrsqrt.f32 %v210_v26  ;;  %vm219_vm12 = vmor %vm217_vm11, %vm218_vm10  ;;  %vm227_vm15 = vweird.f32 %v210_v26  ;;  %vm672_vm10 = vcmask 162816   ;;  %vm326_vm11 = vcmask 1042434  }
 0x19e   :  { %v213_v27 = vmul.f32 %v1256_v24, %v212_v25 }
 0x1a0   :  { %v214_v28 = vmul.f32 0.5, %v213_v27 }
 0x1a2   :  { %v215_v29 = vsub.f32 1.5, %v214_v28  ;;  %v628_v30 = vpop.permute.xlu2 %627 }
 0x1a3   :  { %v1258_v31 = vpop.eup %1257  ;;  %v659_v50 = vsel %vm133_vm5, %v657_v45, %v628_v30 }
 0x1a4   :  { %v216_v33 = vmul.f32 %v1256_v24, %v215_v29  ;;  %v222_v36 = vmul.f32 %v1258_v31, %v210_v26  ;;  %vm228_vm13 = vweird.f32 %v1258_v31 }
 0x1a5   :  { %vm229_vm1 = vmor %vm227_vm15, %vm228_vm13  ;;  %vm330_vm13 = vcmask 1044484  }
 0x1a6   :  { %v220_v38 = vsel %vm219_vm12, %v1256_v24, %v216_v33  ;;  %v223_v41 = vmul.f32 %v1258_v31, %v222_v36  ;;  %vm328_vm12 = vcmask 1043459  }
 0x1a7   :  { %v231_v40 = vmul.f32 %v220_v38, %v207_v34 }
 0x1a8   :  { %v224_v44 = vmul.f32 0.5, %v223_v41 }
 0x1a9   :  { %v237_v43 = vmul.f32 %v1235_v35, %v231_v40 }
 0x1aa   :  { %v640_v46 = vpop.permute.xlu2 %639  ;;  %v225_v47 = vsub.f32 1.5, %v224_v44 }
 0x1ab   :  { %v243_v32 = vadd.f32 %v1236_v39, %v237_v43  ;;  %v661_v42 = vsel %vm142_vm6, %v659_v50, %v640_v46 }
 0x1ac   :  { %v226_v49 = vmul.f32 %v1258_v31, %v225_v47 }
 0x1ad   :  { %v245_v48 = vmax.f32 %v243_v32, 0.0 }
 0x1ae   :  { %v230_v52 = vsel %vm229_vm1, %v1258_v31, %v226_v49 }
 0x1af   :  { %v249_v53 = vrot.slane %v245_v48, 2  ;;  %v250_v54 = vrot.slane %v245_v48, 4  ;;  %v251_v55 = vrot.slane %v245_v48, 6  ;;  %v232_v56 = vmul.f32 %v230_v52, %v208_v51 }
 0x1b0   :  { %v262_v57 = vsel %vm261_vm14, %v245_v48, -inf }
 0x1b1   :  { %v263_v58 = vrot.slane %v262_v57, 4  ;;  %v269_v59 = vsel %vm261_vm14, %v249_v53, -inf  ;;  %v276_v60 = vsel %vm261_vm14, %v250_v54, -inf  ;;  %v283_v61 = vsel %vm261_vm14, %v251_v55, -inf }
 0x1b2   :  { %v238_v37 = vmul.f32 %v1235_v35, %v232_v56  ;;  %v652_v63 = vpop.permute.xlu2 %651  ;;  %v270_v0 = vrot.slane %v269_v59, 4  ;;  %v277_v2 = vrot.slane %v276_v60, 4  ;;  %v284_v3 = vrot.slane %v283_v61, 4 }
 0x1b3   :  { %v663_v4 = vsel %vm362_vm9, %v661_v42, %v652_v63  ;;  %v264_v5 = vmax.f32 %v262_v57, %v263_v58  ;;  %v648_v63 = vrot.slane %v1529_v11, 4 }
 0x1b4   :  { %v244_v6 = vadd.f32 %v1236_v39, %v238_v37  ;;  %1221 = vmatmul.msk.f32.vlgmr.msra.gmra.mxu3 %vm672_vm10, %v663_v4  ;;  %v271_v7 = vmax.f32 %v269_v59, %v270_v0  ;;  %v278_v8 = vmax.f32 %v276_v60, %v277_v2  ;;  %v285_v9 = vmax.f32 %v283_v61, %v284_v3 }
 0x1b5   :  { %v265_v10 = vrot.slane %v264_v5, 2  ;;  %v649_v0 = vrot.slane %v1537_v17, 4 }
 0x1b6   :  { %v246_v12 = vmax.f32 %v244_v6, 0.0  ;;  %v272_v1 = vrot.slane %v271_v7, 2  ;;  %v279_v13 = vrot.slane %v278_v8, 2  ;;  %v286_v14 = vrot.slane %v285_v9, 2 }
 0x1b7   :  { %v266_v15 = vmax.f32 %v264_v5, %v265_v10 }
 0x1b8   :  { %v273_v16 = vmax.f32 %v271_v7, %v272_v1  ;;  %v280_v18 = vmax.f32 %v278_v8, %v279_v13  ;;  %v287_v19 = vmax.f32 %v285_v9, %v286_v14  ;;  %v252_v20 = vrot.slane %v246_v12, 2 }
 0x1b9   :  { %v267_v21 = vrot.slane %v266_v15, 1  ;;  %v253_v22 = vrot.slane %v246_v12, 4  ;;  %v254_v23 = vrot.slane %v246_v12, 6  ;;  %v290_v24 = vsel %vm261_vm14, %v246_v12, -inf }
 0x1ba   :  { %v274_v25 = vrot.slane %v273_v16, 1  ;;  %v281_v26 = vrot.slane %v280_v18, 1  ;;  %v288_v27 = vrot.slane %v287_v19, 1  ;;  %v291_v28 = vrot.slane %v290_v24, 4 }
 0x1bb   :  { %v297_v29 = vsel %vm261_vm14, %v252_v20, -inf  ;;  %v304_v30 = vsel %vm261_vm14, %v253_v22, -inf  ;;  %v311_v31 = vsel %vm261_vm14, %v254_v23, -inf  ;;  %v268_v33 = vmax.f32 %v266_v15, %v267_v21  ;;  %v367_v21 = vld [vmem:[%s1913_s30 + $0x10] sm:$0xff]  ;;  %v366_v22 = vld [vmem:[%s1913_s30 + $0x8] sm:$0xff]  ;;  %v618_v23 = vpop.permute.xlu0 %617 }
 0x1bc   :  { %v275_v34 = vmax.f32 %v273_v16, %v274_v25  ;;  %v282_v35 = vmax.f32 %v280_v18, %v281_v26  ;;  %v292_v36 = vmax.f32 %v290_v24, %v291_v28  ;;  %v298_v38 = vrot.slane %v297_v29, 4  ;;  %394 = vmatpush.msra.mxu1 %v367_v21  ;;  %v1237_v24 = vld [vmem:[%s1877_s14] ss:$0 sm:$0xff]  ;;  %s1917_s14 = sld [smem:[#allocation14_spill]] }
 0x1bd   :  { %v305_v39 = vrot.slane %v304_v30, 4  ;;  %v312_v40 = vrot.slane %v311_v31, 4  ;;  %v289_v41 = vmax.f32 %v287_v19, %v288_v27  ;;  %v650_v8 = vsel %vm1895_vm3, %v648_v63, %v649_v0 }
 0x1be   :  { %v327_v43 = vsel %vm326_vm11, %v275_v34, %v268_v33  ;;  %v293_v44 = vrot.slane %v292_v36, 2  ;;  %v299_v46 = vmax.f32 %v297_v29, %v298_v38  ;;  %v636_v14 = vrot.slane %v1529_v11, 3  ;;  %395 = vmatpush.msra.mxu1 %v366_v22 }
 0x1bf   :  { %v329_v45 = vsel %vm328_vm12, %v282_v35, %v327_v43  ;;  %v306_v32 = vmax.f32 %v304_v30, %v305_v39  ;;  %v313_v47 = vmax.f32 %v311_v31, %v312_v40  ;;  %v637_v15 = vrot.slane %v1537_v17, 3 }
 0x1c0   :  { %v331_v48 = vsel %vm330_vm13, %v289_v41, %v329_v45  ;;  %v294_v49 = vmax.f32 %v292_v36, %v293_v44  ;;  %v300_v51 = vrot.slane %v299_v46, 2  ;;  %v624_v16 = vrot.slane %v1529_v11, 2 }
 0x1c1   :  { %v337_v50 = vsel %vm95_vm0, 0.0, %v331_v48  ;;  %v307_v52 = vrot.slane %v306_v32, 2  ;;  %v314_v53 = vrot.slane %v313_v47, 2  ;;  %v625_v18 = vrot.slane %v1537_v17, 2  ;;  %v365_v17 = vld [vmem:[%s1913_s30] sm:$0xff]  ;;  %s1916_s30 = sld [smem:[#allocation13_spill]] }
 0x1c2   :  { %v340_v54 = vsel %vm339_vm8, %v337_v50, 0.0  ;;  %v295_v55 = vrot.slane %v294_v49, 1  ;;  %v301_v57 = vmax.f32 %v299_v46, %v300_v51  ;;  %v638_v19 = vsel %vm339_vm8, %v636_v14, %v637_v15  ;;  %396 = vmatpush.msra.mxu1 %v365_v17 }
 0x1c3   :  { %v352_v56 = vrot.slane %v340_v54, 2  ;;  %v344_v42 = vrot.slane %v340_v54, 1  ;;  %v308_v58 = vmax.f32 %v306_v32, %v307_v52  ;;  %v315_v59 = vmax.f32 %v313_v47, %v314_v53  ;;  %v1238_v32 = vld [vmem:[%s1914_s6] ss:$0 sm:$0xff] }
 0x1c4   :  { %v302_v60 = vrot.slane %v301_v57, 1  ;;  %v296_v2 = vmax.f32 %v294_v49, %v295_v55  ;;  %v626_v20 = vsel %vm117_vm2, %v624_v16, %v625_v18  ;;  %v658_v38 = vsel %vm130_vm4, %v1529_v11, %v618_v23 }
 0x1c5   :  { %354 = vrot.lane.b32.xlu2 %v352_v56, %s1300_s4  ;;  %346 = vrot.lane.b32.xlu0 %v344_v42, %s1298_s28  ;;  %v309_v61 = vrot.slane %v308_v58, 1  ;;  %v316_v37 = vrot.slane %v315_v59, 1 }
 0x1c6   :  { %v303_v3 = vmax.f32 %v301_v57, %v302_v60 }
 0x1c7   :  { %v310_v4 = vmax.f32 %v308_v58, %v309_v61  ;;  %v317_v5 = vmax.f32 %v315_v59, %v316_v37 }
 0x1c8   :  { %v332_v6 = vsel %vm326_vm11, %v303_v3, %v296_v2 }
 0x1c9   :  { %v333_v7 = vsel %vm328_vm12, %v310_v4, %v332_v6 }
 0x1ca   :  { %v334_v9 = vsel %vm330_vm13, %v317_v5, %v333_v7 }
 0x1cb   :  { %v338_v10 = vsel %vm95_vm0, 0.0, %v334_v9 }
 0x1cc   :  { %v341_v12 = vsel %vm339_vm8, %v338_v10, 0.0  ;;  %vm378_vm8 = vcmask 195584  }
 0x1cd   :  { %653 = vrot.lane.b32.xlu0 %v650_v8, %s1300_s4  ;;  %v353_v1 = vrot.slane %v341_v12, 2  ;;  %v345_v13 = vrot.slane %v341_v12, 1 }
 0x1cf   :  { %356 = vrot.lane.b32.xlu2 %v353_v1, %s1300_s4  ;;  %348 = vrot.lane.b32.xlu1 %v345_v13, %s1298_s28 }
 0x1d7   :  { %641 = vrot.lane.b32.xlu1 %v638_v19, %s1299_s7  ;;  %629 = vrot.lane.b32.xlu2 %v626_v20, %s1298_s28 }
 0x21f   :  { %v355_v25 = vpop.permute.xlu2 %354 }
 0x229   :  { %v357_v33 = vpop.permute.xlu2 %356 }
 0x231   :  { %v630_v39 = vpop.permute.xlu2 %629 }
 0x232   :  { %v660_v41 = vsel %vm133_vm5, %v658_v38, %v630_v39 }
 0x237   :  { %v347_v26 = vpop.permute.xlu0 %346  ;;  %v699_v27 = vpop.f32.mrf.mxu3 }
 0x238   :  { %v360_v28 = vsel %vm133_vm5, %v340_v54, %v347_v26  ;;  %v1604_v29 = vadd.f32 %v1237_v24, %v699_v27 }
 0x239   :  { %v363_v30 = vsel %vm362_vm9, %v360_v28, %v355_v25  ;;  %v1239_v28 = vld [vmem:[%s1915_s2] ss:$0 sm:$0xff] }
 0x23a   :  { %374 = vst [vmem:[#allocation1] ss:$2 sm:$0xff] %v363_v30  ;;  %v705_v31 = vsel %vm133_vm5, %v1604_v29, 0.0  ;;  %v713_v54 = vmul.f32 %v1604_v29, %v1604_v29 }
 0x23b   :  { %706 = vadd.xlane.f32.xlu0 %v705_v31 }
 0x23c   :  { %v715_v42 = vsel %vm133_vm5, %v713_v54, 0.0 }
 0x23f   :  { %v654_v40 = vpop.permute.xlu0 %653 }
 0x241   :  { %v349_v34 = vpop.permute.xlu1 %348 }
 0x242   :  { %v361_v35 = vsel %vm133_vm5, %v341_v12, %v349_v34  ;;  %v1240_v34 = vld [vmem:[%s1916_s30] ss:$0 sm:$0xff] }
 0x243   :  { %v364_v36 = vsel %vm362_vm9, %v361_v35, %v357_v33 }
 0x244   :  { %376 = vst [vmem:[#allocation1 + $0x1] ss:$2 sm:$0xff] %v364_v36 }
 0x249   :  { %v642_v43 = vpop.permute.xlu1 %641 }
 0x24a   :  { %v662_v44 = vsel %vm142_vm6, %v660_v41, %v642_v43 }
 0x24b   :  { %v377_v45 = vld.sshfl [vmem:[#allocation1] sm:$0xff pattern:$0x75316420]  ;;  %v664_v46 = vsel %vm362_vm9, %v662_v44, %v654_v40 }
 0x24c   :  { %1218 = vmatmul.msk.f32.vlgmr.msra.gmra.mxu1 %vm378_vm8, %v377_v45  ;;  %1222 = vmatmul.msk.f32.gmra.mxu3 %vm672_vm10, %v664_v46 }
 0x2ae   :  { %v707_v57 = vpop.xlane.xlu0 %706 }
 0x2af   :  { %v711_v6 = vmul.f32 %v707_v57, %v1516_v62 }
 0x2b1   :  { %v723_v10 = vmul.f32 %v711_v6, %v711_v6 }
 0x2c9   :  { %v398_v11 = vpop.f32.mrf.mxu1 }
 0x2ca   :  { %v399_v47 = vadd.f32 %v1238_v32, %v398_v11  ;;  %v1241_v32 = vld [vmem:[%s1878_s15] ss:$0 sm:$0xff]  ;;  %s1302_s15 = smov 24  }
 0x2cc   :  { %v401_v48 = vsel %vm133_vm5, %v399_v47, 0.0  ;;  %v405_v49 = vmul.f32 %v399_v47, %v399_v47 }
 0x2cd   :  { %402 = vadd.xlane.f32.xlu2 %v401_v48  ;;  %v729_v48 = vsub.f32 %v1604_v29, %v711_v6 }
 0x2ce   :  { %v406_v50 = vsel %vm133_vm5, %v405_v49, 0.0 }
 0x2cf   :  { %407 = vadd.xlane.f32.xlu1 %v406_v50  ;;  %v702_v51 = vpop.f32.mrf.mxu3  ;;  %v1242_v50 = vld [vmem:[%s1879_s16] ss:$0 sm:$0xff]  ;;  %s1303_s16 = smov 32  }
 0x2d0   :  { %v1623_v52 = vadd.f32 %v1237_v24, %v702_v51 }
 0x2d2   :  { %v714_v53 = vmul.f32 %v1623_v52, %v1623_v52  ;;  %v708_v56 = vsel %vm133_vm5, %v1623_v52, 0.0 }
 0x2d4   :  { %v718_v55 = vsel %vm133_vm5, %v714_v53, 0.0 }
 0x2d5   :  { %719 = vadd.xlane.f32.xlu0 %v718_v55  ;;  %709 = vadd.xlane.f32.xlu2 %v708_v56 }
 0x2d7   :  { %716 = vadd.xlane.f32.xlu1 %v715_v42 }
 0x340   :  { %v403_v58 = vpop.xlane.xlu2 %402 }
 0x341   :  { %v404_v59 = vmul.f32 %v403_v58, %v1516_v62 }
 0x342   :  { %v408_v60 = vpop.xlane.xlu1 %407 }
 0x343   :  { %v410_v61 = vmul.f32 %v404_v59, %v404_v59  ;;  %v409_v37 = vmul.f32 %v408_v60, %v1516_v62  ;;  %v413_v27 = vsub.f32 %v399_v47, %v404_v59 }
 0x345   :  { %v411_v63 = vsub.f32 %v409_v37, %v410_v61 }
 0x347   :  { %v412_v0 = vmax.f32 %v411_v63, 0.0 }
 0x348   :  { %v720_v2 = vpop.xlane.xlu0 %719  ;;  %v710_v3 = vpop.xlane.xlu2 %709 }
 0x349   :  { %v414_v4 = vadd.f32 1e-05, %v412_v0  ;;  %v712_v5 = vmul.f32 %v710_v3, %v1516_v62  ;;  %v722_v8 = vmul.f32 %v720_v2, %v1516_v62 }
 0x34a   :  { %v717_v7 = vpop.xlane.xlu1 %716 }
 0x34b   :  { %1259 = vrsqrt.f32 %v414_v4  ;;  %v724_v9 = vmul.f32 %v712_v5, %v712_v5  ;;  %v721_v12 = vmul.f32 %v717_v7, %v1516_v62  ;;  %vm421_vm6 = vweird.f32 %v414_v4 }
 0x34c   :  { %v730_v11 = vsub.f32 %v1623_v52, %v712_v5 }
 0x34d   :  { %v726_v1 = vsub.f32 %v722_v8, %v724_v9  ;;  %v725_v13 = vsub.f32 %v721_v12, %v723_v10 }
 0x34f   :  { %v728_v14 = vmax.f32 %v726_v1, 0.0  ;;  %v727_v15 = vmax.f32 %v725_v13, 0.0 }
 0x351   :  { %v1260_v16 = vpop.eup %1259  ;;  %v732_v18 = vadd.f32 1e-05, %v728_v14  ;;  %v731_v20 = vadd.f32 1e-05, %v727_v15 }
 0x352   :  { %v416_v19 = vmul.f32 %v1260_v16, %v414_v4  ;;  %vm422_vm4 = vweird.f32 %v1260_v16 }
 0x353   :  { %1261 = vrsqrt.f32 %v732_v18  ;;  %vm423_vm15 = vmor %vm421_vm6, %vm422_vm4  ;;  %vm749_vm3 = vweird.f32 %v732_v18  ;;  %vm739_vm6 = vweird.f32 %v731_v20 }
 0x354   :  { %v417_v21 = vmul.f32 %v1260_v16, %v416_v19  ;;  %1263 = vrsqrt.f32 %v731_v20 }
 0x356   :  { %v418_v22 = vmul.f32 0.5, %v417_v21 }
 0x358   :  { %v419_v17 = vsub.f32 1.5, %v418_v22 }
 0x359   :  { %v1262_v23 = vpop.eup %1261 }
 0x35a   :  { %v1264_v24 = vpop.eup %1263  ;;  %v420_v25 = vmul.f32 %v1260_v16, %v419_v17  ;;  %v744_v26 = vmul.f32 %v1262_v23, %v732_v18  ;;  %vm750_vm1 = vweird.f32 %v1262_v23 }
 0x35b   :  { %v734_v30 = vmul.f32 %v1264_v24, %v731_v20  ;;  %vm740_vm10 = vweird.f32 %v1264_v24  ;;  %vm751_vm4 = vmor %vm749_vm3, %vm750_vm1  ;;  %vm849_vm3 = vcmask 1045509  }
 0x35c   :  { %v424_v31 = vsel %vm423_vm15, %v1260_v16, %v420_v25  ;;  %v745_v33 = vmul.f32 %v1262_v23, %v744_v26  ;;  %vm741_vm15 = vmor %vm739_vm6, %vm740_vm10 }
 0x35d   :  { %v425_v35 = vmul.f32 %v424_v31, %v413_v27  ;;  %v735_v36 = vmul.f32 %v1264_v24, %v734_v30 }
 0x35e   :  { %v746_v38 = vmul.f32 0.5, %v745_v33 }
 0x35f   :  { %v430_v39 = vmul.f32 %v1239_v28, %v425_v35  ;;  %v736_v40 = vmul.f32 0.5, %v735_v36 }
 0x360   :  { %v747_v41 = vsub.f32 1.5, %v746_v38 }
 0x361   :  { %v435_v43 = vadd.f32 %v1240_v34, %v430_v39  ;;  %v737_v44 = vsub.f32 1.5, %v736_v40 }
 0x362   :  { %v748_v45 = vmul.f32 %v1262_v23, %v747_v41 }
 0x363   :  { %v436_v46 = vmax.f32 %v435_v43, 0.0  ;;  %v738_v47 = vmul.f32 %v1264_v24, %v737_v44 }
 0x364   :  { %v752_v49 = vsel %vm751_vm4, %v1262_v23, %v748_v45  ;;  %vm1918_vm4 = vcmask 1043456  }
 0x365   :  { %v754_v51 = vmul.f32 %v752_v49, %v730_v11  ;;  %v742_v53 = vsel %vm741_vm15, %v1264_v24, %v738_v47  ;;  %v438_v54 = vrot.slane %v436_v46, 2  ;;  %v444_v55 = vsel %vm261_vm14, %v436_v46, -inf  ;;  %vm1919_vm6 = vmmov %vm1918_vm4 }
 0x366   :  { %v753_v56 = vmul.f32 %v742_v53, %v729_v48  ;;  %v445_v42 = vrot.slane %v444_v55, 4  ;;  %v439_v57 = vrot.slane %v436_v46, 4  ;;  %v440_v52 = vrot.slane %v436_v46, 6 }
 0x367   :  { %v760_v58 = vmul.f32 %v1241_v32, %v754_v51  ;;  %v451_v59 = vsel %vm261_vm14, %v438_v54, -inf }
 0x368   :  { %v759_v60 = vmul.f32 %v1241_v32, %v753_v56  ;;  %v446_v29 = vmax.f32 %v444_v55, %v445_v42  ;;  %v452_v61 = vrot.slane %v451_v59, 4  ;;  %v458_v37 = vsel %vm261_vm14, %v439_v57, -inf }
 0x369   :  { %v766_v63 = vadd.f32 %v1242_v50, %v760_v58  ;;  %v459_v0 = vrot.slane %v458_v37, 4  ;;  %v465_v2 = vsel %vm261_vm14, %v440_v52, -inf }
 0x36a   :  { %v765_v3 = vadd.f32 %v1242_v50, %v759_v60  ;;  %v447_v4 = vrot.slane %v446_v29, 2  ;;  %v1657_v5 = vmax.f32 %v451_v59, %v452_v61  ;;  %v466_v7 = vrot.slane %v465_v2, 4 }
 0x36b   :  { %v768_v6 = vmax.f32 %v766_v63, 0.0  ;;  %v1662_v12 = vmax.f32 %v458_v37, %v459_v0 }
 0x36c   :  { %v767_v8 = vmax.f32 %v765_v3, 0.0  ;;  %v1659_v9 = vmax.f32 %v446_v29, %v447_v4  ;;  %v454_v10 = vrot.slane %v1657_v5, 2  ;;  %v467_v60 = vmax.f32 %v465_v2, %v466_v7 }
 0x36d   :  { %v774_v1 = vrot.slane %v768_v6, 2  ;;  %v775_v13 = vrot.slane %v768_v6, 4  ;;  %v776_v14 = vrot.slane %v768_v6, 6  ;;  %v811_v15 = vsel %vm261_vm14, %v768_v6, -inf }
 0x36e   :  { %v812_v16 = vrot.slane %v811_v15, 4  ;;  %v771_v18 = vrot.slane %v767_v8, 2  ;;  %v772_v19 = vrot.slane %v767_v8, 4  ;;  %v783_v20 = vsel %vm261_vm14, %v767_v8, -inf }
 0x36f   :  { %v818_v21 = vsel %vm261_vm14, %v774_v1, -inf  ;;  %v825_v22 = vsel %vm261_vm14, %v775_v13, -inf  ;;  %v832_v17 = vsel %vm261_vm14, %v776_v14, -inf  ;;  %v784_v23 = vrot.slane %v783_v20, 4 }
 0x370   :  { %v813_v24 = vmax.f32 %v811_v15, %v812_v16  ;;  %v819_v25 = vrot.slane %v818_v21, 4  ;;  %v826_v26 = vrot.slane %v825_v22, 4  ;;  %v833_v27 = vrot.slane %v832_v17, 4 }
 0x371   :  { %v773_v28 = vrot.slane %v767_v8, 6  ;;  %v785_v30 = vmax.f32 %v783_v20, %v784_v23  ;;  %v790_v31 = vsel %vm261_vm14, %v771_v18, -inf  ;;  %v797_v33 = vsel %vm261_vm14, %v772_v19, -inf }
 0x372   :  { %v814_v34 = vrot.slane %v813_v24, 2  ;;  %v820_v35 = vmax.f32 %v818_v21, %v819_v25  ;;  %v827_v36 = vmax.f32 %v825_v22, %v826_v26  ;;  %v834_v38 = vmax.f32 %v832_v17, %v833_v27 }
 0x373   :  { %v786_v39 = vrot.slane %v785_v30, 2  ;;  %v791_v40 = vrot.slane %v790_v31, 4  ;;  %v798_v41 = vrot.slane %v797_v33, 4  ;;  %v804_v43 = vsel %vm261_vm14, %v773_v28, -inf }
 0x374   :  { %v815_v44 = vmax.f32 %v813_v24, %v814_v34  ;;  %v821_v45 = vrot.slane %v820_v35, 2  ;;  %v828_v46 = vrot.slane %v827_v36, 2  ;;  %v805_v32 = vrot.slane %v804_v43, 4 }
 0x375   :  { %v787_v11 = vmax.f32 %v785_v30, %v786_v39  ;;  %v792_v47 = vmax.f32 %v790_v31, %v791_v40  ;;  %v799_v48 = vmax.f32 %v797_v33, %v798_v41  ;;  %v835_v49 = vrot.slane %v834_v38, 2 }
 0x376   :  { %v816_v50 = vrot.slane %v815_v44, 1  ;;  %v822_v51 = vmax.f32 %v820_v35, %v821_v45  ;;  %v806_v53 = vmax.f32 %v804_v43, %v805_v32  ;;  %v829_v54 = vmax.f32 %v827_v36, %v828_v46 }
 0x377   :  { %v788_v55 = vrot.slane %v787_v11, 1  ;;  %v793_v56 = vrot.slane %v792_v47, 2  ;;  %v800_v42 = vrot.slane %v799_v48, 2  ;;  %v836_v57 = vmax.f32 %v834_v38, %v835_v49 }
 0x378   :  { %v807_v52 = vrot.slane %v806_v53, 2  ;;  %v823_v58 = vrot.slane %v822_v51, 1  ;;  %v830_v59 = vrot.slane %v829_v54, 1  ;;  %v817_v37 = vmax.f32 %v815_v44, %v816_v50 }
 0x379   :  { %v794_v29 = vmax.f32 %v792_v47, %v793_v56  ;;  %v801_v61 = vmax.f32 %v799_v48, %v800_v42  ;;  %v837_v63 = vrot.slane %v836_v57, 1  ;;  %v789_v0 = vmax.f32 %v787_v11, %v788_v55  ;;  %v509_v42 = vld [vmem:[%s1917_s14 + $0x10] sm:$0xff] }
 0x37a   :  { %v808_v3 = vmax.f32 %v806_v53, %v807_v52  ;;  %v824_v4 = vmax.f32 %v822_v51, %v823_v58  ;;  %v831_v6 = vmax.f32 %v829_v54, %v830_v59  ;;  %v449_v13 = vrot.slane %v1659_v9, 1  ;;  %535 = vmatpush.msra.mxu2 %v509_v42  ;;  %v507_v52 = vld [vmem:[%s1917_s14] sm:$0xff]  ;;  %v906_v59 = vld [vmem:[%s1880_s17 + $0x18] sm:$0xff] }
 0x37b   :  { %v795_v8 = vrot.slane %v794_v29, 1  ;;  %v802_v1 = vrot.slane %v801_v61, 1  ;;  %v455_v14 = vmax.f32 %v1657_v5, %v454_v10  ;;  %v838_v16 = vmax.f32 %v836_v57, %v837_v63  ;;  %v508_v57 = vld [vmem:[%s1917_s14 + $0x8] sm:$0xff]  ;;  %v907_v58 = vld [vmem:[%s1880_s17 + $0x20] sm:$0xff] }
 0x37c   :  { %v809_v15 = vrot.slane %v808_v3, 1  ;;  %v851_v18 = vsel %vm328_vm12, %v824_v4, %v817_v37  ;;  %v461_v2 = vrot.slane %v1662_v12, 2  ;;  %v468_v23 = vrot.slane %v467_v60, 2  ;;  %536 = vmatpush.msra.mxu2 %v508_v57  ;;  %932 = vmatpush.msrb.mxu1 %v907_v58  ;;  %v904_v37 = vld [vmem:[%s1880_s17 + $0x8] sm:$0xff]  ;;  %v903_v63 = vld [vmem:[%s1880_s17] sm:$0xff] }
 0x37d   :  { %v796_v7 = vmax.f32 %v794_v29, %v795_v8  ;;  %v803_v19 = vmax.f32 %v801_v61, %v802_v1  ;;  %v852_v20 = vsel %vm330_vm13, %v831_v6, %v851_v18  ;;  %v456_v21 = vrot.slane %v455_v14, 1 }
 0x37e   :  { %v853_v22 = vsel %vm849_vm3, %v838_v16, %v852_v20  ;;  %v462_v17 = vmax.f32 %v1662_v12, %v461_v2  ;;  %v810_v24 = vmax.f32 %v808_v3, %v809_v15  ;;  %v469_v30 = vmax.f32 %v467_v60, %v468_v23  ;;  %537 = vmatpush.msra.mxu2 %v507_v52  ;;  %v905_v60 = vld [vmem:[%s1880_s17 + $0x10] sm:$0xff] }
 0x37f   :  { %v847_v25 = vsel %vm328_vm12, %v796_v7, %v789_v0  ;;  %v857_v5 = vsel %vm600_vm7, 0.0, %v853_v22  ;;  %v457_v10 = vmax.f32 %v455_v14, %v456_v21  ;;  %v450_v12 = vmax.f32 %v1659_v9, %v449_v13  ;;  %933 = vmatpush.msrb.mxu1 %v906_v59 }
 0x380   :  { %v848_v26 = vsel %vm330_vm13, %v803_v19, %v847_v25  ;;  %v1683_v27 = vsel %vm117_vm2, %v857_v5, 0.0  ;;  %v463_v28 = vrot.slane %v462_v17, 1  ;;  %v470_v36 = vrot.slane %v469_v30, 1 }
 0x381   :  { %v850_v31 = vsel %vm849_vm3, %v810_v24, %v848_v26  ;;  %v863_v33 = vrot.slane %v1683_v27, 1  ;;  %v476_v39 = vsel %vm326_vm11, %v457_v10, %v450_v12  ;;  %vm482_vm13 = vcmask 1042432   ;;  %934 = vmatpush.msrb.mxu1 %v905_v60  ;;  %v1244_v26 = vld [vmem:[%s1881_s18] ss:$0 sm:$0xff] }
 0x382   :  { %v856_v34 = vsel %vm600_vm7, 0.0, %v850_v31  ;;  %v464_v35 = vmax.f32 %v462_v17, %v463_v28  ;;  %v471_v43 = vmax.f32 %v469_v30, %v470_v36  ;;  %v480_v9 = vsel %vm95_vm0, 0.0, %v476_v39 }
 0x383   :  { %v1690_v38 = vsel %vm117_vm2, %v856_v34, 0.0  ;;  %866 = vrot.lane.b32.xlu1 %v863_v33, %s1298_s28  ;;  %v483_v32 = vsel %vm482_vm13, %v480_v9, 0.0  ;;  %v871_v48 = vrot.slane %v1683_v27, 2  ;;  %v887_v53 = vrot.slane %v1683_v27, 4  ;;  %935 = vmatpush.msrb.mxu1 %v904_v37 }
 0x384   :  { %v862_v40 = vrot.slane %v1690_v38, 1  ;;  %v870_v41 = vrot.slane %v1690_v38, 2  ;;  %v477_v44 = vsel %vm326_vm11, %v471_v43, %v464_v35  ;;  %v487_v47 = vrot.slane %v483_v32, 1 }
 0x385   :  { %v481_v45 = vsel %vm95_vm0, 0.0, %v477_v44  ;;  %v878_v49 = vrot.slane %v1690_v38, 3  ;;  %v495_v51 = vrot.slane %v483_v32, 2  ;;  %v879_v54 = vrot.slane %v1683_v27, 3  ;;  %936 = vmatpush.msrb.mxu1 %v903_v63 }
 0x386   :  { %864 = vrot.lane.b32.xlu0 %v862_v40, %s1298_s28  ;;  %872 = vrot.lane.b32.xlu2 %v870_v41, %s1300_s4  ;;  %v484_v46 = vsel %vm482_vm13, %v481_v45, 0.0  ;;  %v886_v55 = vrot.slane %v1690_v38, 4  ;;  %vm900_vm0 = vcmask 261120   ;;  %vm918_vm2 = vcmask 326656  }
 0x387   :  { %v488_v11 = vrot.slane %v484_v46, 1  ;;  %v496_v50 = vrot.slane %v484_v46, 2  ;;  %vm1158_vm3 = vcmask 1041409  }
 0x38b   :  { %491 = vrot.lane.b32.xlu1 %v488_v11, %s1298_s28 }
 0x38e   :  { %489 = vrot.lane.b32.xlu2 %v487_v47, %s1298_s28  ;;  %874 = vrot.lane.b32.xlu0 %v871_v48, %s1300_s4  ;;  %v1245_v47 = vld [vmem:[%s1882_s19] ss:$0 sm:$0xff] }
 0x393   :  { %880 = vrot.lane.b32.xlu1 %v878_v49, %s1302_s15  ;;  %v1246_v49 = vld [vmem:[%s1883_s20] ss:$0 sm:$0xff]  ;;  %s1304_s20 = smov [#allocation2]  }
 0x396   :  { %499 = vrot.lane.b32.xlu2 %v496_v50, %s1300_s4  ;;  %497 = vrot.lane.b32.xlu0 %v495_v51, %s1300_s4 }
 0x39b   :  { %890 = vrot.lane.b32.xlu1 %v887_v53, %s1303_s16 }
 0x39e   :  { %882 = vrot.lane.b32.xlu2 %v879_v54, %s1302_s15  ;;  %888 = vrot.lane.b32.xlu0 %v886_v55, %s1303_s16 }
 0x3e0   :  { %v873_v56 = vpop.permute.xlu2 %872 }
 0x3e8   :  { %v490_v29 = vpop.permute.xlu2 %489 }
 0x3e9   :  { %v503_v14 = vsel %vm133_vm5, %v483_v32, %v490_v29 }
 0x3f0   :  { %v500_v4 = vpop.permute.xlu2 %499 }
 0x3f5   :  { %v867_v61 = vpop.permute.xlu1 %866 }
 0x3f6   :  { %v895_v18 = vsel %vm133_vm5, %v1683_v27, %v867_v61 }
 0x3f8   :  { %v865_v0 = vpop.permute.xlu0 %864  ;;  %v883_v20 = vpop.permute.xlu2 %882 }
 0x3f9   :  { %v894_v2 = vsel %vm133_vm5, %v1690_v38, %v865_v0 }
 0x3fa   :  { %v896_v21 = vsel %vm362_vm9, %v894_v2, %v873_v56 }
 0x3fd   :  { %v492_v3 = vpop.permute.xlu1 %491 }
 0x3fe   :  { %v504_v6 = vsel %vm133_vm5, %v484_v46, %v492_v3 }
 0x3ff   :  { %v506_v8 = vsel %vm362_vm9, %v504_v6, %v500_v4 }
 0x400   :  { %v875_v1 = vpop.permute.xlu0 %874  ;;  %518 = vst [vmem:[#allocation1 + $0x1] ss:$4 sm:$0xff] %v506_v8 }
 0x401   :  { %v897_v7 = vsel %vm362_vm9, %v895_v18, %v875_v1 }
 0x402   :  { %v899_v22 = vsel %vm378_vm8, %v897_v7, %v883_v20 }
 0x405   :  { %v881_v13 = vpop.permute.xlu1 %880 }
 0x406   :  { %v898_v17 = vsel %vm378_vm8, %v896_v21, %v881_v13 }
 0x408   :  { %v498_v15 = vpop.permute.xlu0 %497 }
 0x409   :  { %v505_v16 = vsel %vm362_vm9, %v503_v14, %v498_v15 }
 0x40a   :  { %516 = vst [vmem:[#allocation1] ss:$4 sm:$0xff] %v505_v16 }
 0x40d   :  { %v891_v19 = vpop.permute.xlu1 %890 }
 0x40e   :  { %v902_v24 = vsel %vm900_vm0, %v899_v22, %v891_v19 }
 0x410   :  { %v889_v23 = vpop.permute.xlu0 %888 }
 0x411   :  { %v901_v25 = vsel %vm900_vm0, %v898_v17, %v889_v23  ;;  %v519_v5 = vld.sshfl [vmem:[#allocation1] sm:$0xff pattern:$0x73625140] }
 0x412   :  { %1219 = vmatmul.msk.f32.vlgmr.msra.gmra.mxu2 %vm378_vm8, %v519_v5  ;;  %914 = vst [vmem:[#allocation1] ss:$2 sm:$0xff] %v901_v25 }
 0x413   :  { %916 = vst [vmem:[#allocation1 + $0x1] ss:$2 sm:$0xff] %v902_v24 }
 0x41a   :  { %v917_v10 = vld.sshfl [vmem:[#allocation1] sm:$0xff pattern:$0x75316420] }
 0x41b   :  { %1223 = vmatmul.msk.f32.vlgmr.msrb.gmra.mxu1 %vm918_vm2, %v917_v10 }
 0x498   :  { %v938_v27 = vpop.f32.mrf.mxu1 }
 0x499   :  { %v939_v28 = vadd.f32 %v1244_v26, %v938_v27 }
 0x49b   :  { %v941_v30 = vsel %vm133_vm5, %v939_v28, 0.0  ;;  %v945_v31 = vmul.f32 %v939_v28, %v939_v28 }
 0x49c   :  { %942 = vadd.xlane.f32.xlu2 %v941_v30 }
 0x49d   :  { %v946_v33 = vsel %vm133_vm5, %v945_v31, 0.0 }
 0x49e   :  { %947 = vadd.xlane.f32.xlu0 %v946_v33 }
 0x50f   :  { %v943_v12 = vpop.xlane.xlu2 %942 }
 0x510   :  { %v944_v34 = vmul.f32 %v943_v12, %v1516_v62 }
 0x511   :  { %v948_v35 = vpop.xlane.xlu0 %947 }
 0x512   :  { %v950_v36 = vmul.f32 %v944_v34, %v944_v34  ;;  %v949_v38 = vmul.f32 %v948_v35, %v1516_v62  ;;  %v953_v11 = vsub.f32 %v939_v28, %v944_v34 }
 0x514   :  { %v951_v39 = vsub.f32 %v949_v38, %v950_v36  ;;  %v1243_v36 = vld [vmem:[%s1920_s11] ss:$0 sm:$0xff]  ;;  %v539_v38 = vpop.f32.mrf.mxu2  ;;  %s1204_s11 = sshll.u32 %s1304_s20, 4  ;;  %s1205_s11 = int_to_ptr.vmem [resolvable:$true] %s1204_s11 }
 0x516   :  { %v952_v40 = vmax.f32 %v951_v39, 0.0  ;;  %v1788_v39 = vadd.f32 %v1243_v36, %v539_v38 }
 0x518   :  { %v954_v41 = vadd.f32 1e-05, %v952_v40 }
 0x51a   :  { %1265 = vrsqrt.f32 %v954_v41  ;;  %vm961_vm1 = vweird.f32 %v954_v41 }
 0x520   :  { %v1266_v43 = vpop.eup %1265 }
 0x521   :  { %v956_v9 = vmul.f32 %v1266_v43, %v954_v41  ;;  %vm962_vm11 = vweird.f32 %v1266_v43 }
 0x522   :  { %vm963_vm10 = vmor %vm961_vm1, %vm962_vm11 }
 0x523   :  { %v957_v44 = vmul.f32 %v1266_v43, %v956_v9 }
 0x525   :  { %v958_v45 = vmul.f32 0.5, %v957_v44  ;;  %v1070_v44 = vld [vmem:[%s1884_s21 + $0x20] sm:$0xff] }
 0x526   :  { %1094 = vmatpush.msrb.mxu2 %v1070_v44 }
 0x527   :  { %v959_v46 = vsub.f32 1.5, %v958_v45  ;;  %v1069_v45 = vld [vmem:[%s1884_s21 + $0x18] sm:$0xff] }
 0x528   :  { %1095 = vmatpush.msrb.mxu2 %v1069_v45 }
 0x529   :  { %v960_v32 = vmul.f32 %v1266_v43, %v959_v46  ;;  %v1068_v46 = vld [vmem:[%s1884_s21 + $0x10] sm:$0xff] }
 0x52a   :  { %1096 = vmatpush.msrb.mxu2 %v1068_v46 }
 0x52b   :  { %v964_v48 = vsel %vm963_vm10, %v1266_v43, %v960_v32  ;;  %v1067_v32 = vld [vmem:[%s1884_s21 + $0x8] sm:$0xff] }
 0x52c   :  { %v965_v50 = vmul.f32 %v964_v48, %v953_v11  ;;  %1097 = vmatpush.msrb.mxu2 %v1067_v32 }
 0x52e   :  { %v970_v51 = vmul.f32 %v1245_v47, %v965_v50  ;;  %v1066_v47 = vld [vmem:[%s1884_s21] sm:$0xff] }
 0x52f   :  { %1098 = vmatpush.msrb.mxu2 %v1066_v47 }
 0x530   :  { %v975_v53 = vadd.f32 %v1246_v49, %v970_v51 }
 0x532   :  { %v976_v54 = vmax.f32 %v975_v53, 0.0 }
 0x534   :  { %v979_v55 = vrot.slane %v976_v54, 4  ;;  %v980_v56 = vrot.slane %v976_v54, 6  ;;  %v978_v42 = vrot.slane %v976_v54, 2  ;;  %v984_v57 = vsel %vm261_vm14, %v976_v54, -inf }
 0x535   :  { %v985_v52 = vrot.slane %v984_v57, 4 }
 0x536   :  { %v998_v58 = vsel %vm261_vm14, %v979_v55, -inf  ;;  %v1005_v59 = vsel %vm261_vm14, %v980_v56, -inf  ;;  %v991_v60 = vsel %vm261_vm14, %v978_v42, -inf }
 0x537   :  { %v999_v29 = vrot.slane %v998_v58, 4  ;;  %v1006_v61 = vrot.slane %v1005_v59, 4  ;;  %v986_v37 = vmax.f32 %v984_v57, %v985_v52  ;;  %v992_v63 = vrot.slane %v991_v60, 4 }
 0x539   :  { %v1000_v0 = vmax.f32 %v998_v58, %v999_v29  ;;  %v1007_v3 = vmax.f32 %v1005_v59, %v1006_v61  ;;  %v987_v4 = vrot.slane %v986_v37, 2  ;;  %v993_v6 = vmax.f32 %v991_v60, %v992_v63  ;;  %v1247_v29 = vld [vmem:[%s1885_s22] ss:$0 sm:$0xff] }
 0x53b   :  { %v1001_v8 = vrot.slane %v1000_v0, 2  ;;  %v1008_v1 = vrot.slane %v1007_v3, 2  ;;  %v988_v13 = vmax.f32 %v986_v37, %v987_v4  ;;  %v994_v14 = vrot.slane %v993_v6, 2 }
 0x53c   :  { %v547_v4 = vmul.f32 %v1788_v39, %v1788_v39 }
 0x53d   :  { %v1002_v15 = vmax.f32 %v1000_v0, %v1001_v8  ;;  %v1009_v16 = vmax.f32 %v1007_v3, %v1008_v1  ;;  %v989_v18 = vrot.slane %v988_v13, 1  ;;  %v995_v2 = vmax.f32 %v993_v6, %v994_v14 }
 0x53f   :  { %v1003_v7 = vrot.slane %v1002_v15, 1  ;;  %v1010_v19 = vrot.slane %v1009_v16, 1  ;;  %v996_v20 = vrot.slane %v995_v2, 1  ;;  %v990_v17 = vmax.f32 %v988_v13, %v989_v18 }
 0x541   :  { %v1004_v21 = vmax.f32 %v1002_v15, %v1003_v7  ;;  %v1011_v22 = vmax.f32 %v1009_v16, %v1010_v19  ;;  %v997_v23 = vmax.f32 %v995_v2, %v996_v20 }
 0x543   :  { %v1017_v24 = vsel %vm328_vm12, %v1011_v22, %v1004_v21  ;;  %v1016_v25 = vsel %vm328_vm12, %v997_v23, %v990_v17  ;;  %v1169_v21 = vld [vmem:[%s1888_s25 + $0x8] sm:$0xff]  ;;  %v1168_v22 = vld [vmem:[%s1888_s25] sm:$0xff]  ;;  %s1921_s25 = sld [smem:[#allocation16_spill]] }
 0x544   :  { %v1021_v5 = vsel %vm600_vm7, 0.0, %v1017_v24  ;;  %v1020_v10 = vsel %vm600_vm7, 0.0, %v1016_v25  ;;  %vm542_vm7 = vcmask 60416   ;;  %1191 = vmatpush.msrb.mxu0 %v1169_v21 }
 0x545   :  { %v1023_v26 = vsel %vm1918_vm4, %v1021_v5, 0.0  ;;  %v1022_v27 = vsel %vm1919_vm6, %v1020_v10, 0.0  ;;  %v543_v41 = vsel %vm542_vm7, %v1788_v39, 0.0  ;;  %v548_v6 = vsel %vm542_vm7, %v547_v4, 0.0  ;;  %v1248_v5 = vld [vmem:[%s1886_s23] ss:$0 sm:$0xff] }
 0x546   :  { %v1043_v28 = vrot.slane %v1023_v26, 3  ;;  %v1050_v30 = vrot.slane %v1022_v27, 4  ;;  %v1026_v31 = vrot.slane %v1022_v27, 1  ;;  %v1027_v33 = vrot.slane %v1023_v26, 1  ;;  %1192 = vmatpush.msrb.mxu0 %v1168_v22 }
 0x547   :  { %v1034_v12 = vrot.slane %v1022_v27, 2  ;;  %v1035_v34 = vrot.slane %v1023_v26, 2  ;;  %v1042_v35 = vrot.slane %v1022_v27, 3  ;;  %v1051_v40 = vrot.slane %v1023_v26, 4 }
 0x548   :  { %1046 = vrot.lane.b32.xlu2 %v1043_v28, %s1302_s15  ;;  %1052 = vrot.lane.b32.xlu0 %v1050_v30, %s1303_s16 }
 0x549   :  { %1028 = vrot.lane.b32.xlu1 %v1026_v31, %s1298_s28 }
 0x551   :  { %1030 = vrot.lane.b32.xlu1 %v1027_v33, %s1298_s28 }
 0x559   :  { %1036 = vrot.lane.b32.xlu1 %v1034_v12, %s1300_s4 }
 0x561   :  { %1038 = vrot.lane.b32.xlu1 %v1035_v34, %s1300_s4 }
 0x569   :  { %1044 = vrot.lane.b32.xlu1 %v1042_v35, %s1302_s15 }
 0x571   :  { %1054 = vrot.lane.b32.xlu1 %v1051_v40, %s1303_s16  ;;  %544 = vadd.xlane.f32.xlu2 %v543_v41 }
 0x5a2   :  { %v1047_v57 = vpop.permute.xlu2 %1046 }
 0x5ba   :  { %v1053_v53 = vpop.permute.xlu0 %1052 }
 0x5bb   :  { %v1029_v43 = vpop.permute.xlu1 %1028 }
 0x5bc   :  { %v1058_v49 = vsel %vm133_vm5, %v1022_v27, %v1029_v43  ;;  %v1250_v27 = vld [vmem:[%s1887_s24] ss:$0 sm:$0xff] }
 0x5c3   :  { %v1031_v9 = vpop.permute.xlu1 %1030 }
 0x5c4   :  { %v1059_v56 = vsel %vm133_vm5, %v1023_v26, %v1031_v9 }
 0x5cb   :  { %v1037_v11 = vpop.permute.xlu1 %1036 }
 0x5cc   :  { %v1060_v50 = vsel %vm362_vm9, %v1058_v49, %v1037_v11 }
 0x5d3   :  { %v1039_v48 = vpop.permute.xlu1 %1038 }
 0x5d4   :  { %v1061_v42 = vsel %vm362_vm9, %v1059_v56, %v1039_v48 }
 0x5d5   :  { %v1063_v52 = vsel %vm378_vm8, %v1061_v42, %v1047_v57 }
 0x5db   :  { %v1045_v51 = vpop.permute.xlu1 %1044 }
 0x5dc   :  { %v1062_v54 = vsel %vm378_vm8, %v1060_v50, %v1045_v51 }
 0x5dd   :  { %v1064_v55 = vsel %vm900_vm0, %v1062_v54, %v1053_v53 }
 0x5de   :  { %1077 = vst [vmem:[#allocation1] ss:$4 sm:$0xff] %v1064_v55 }
 0x5e3   :  { %v1055_v58 = vpop.permute.xlu1 %1054 }
 0x5e4   :  { %v1065_v59 = vsel %vm900_vm0, %v1063_v52, %v1055_v58  ;;  %v545_v48 = vpop.xlane.xlu2 %544 }
 0x5e5   :  { %1079 = vst [vmem:[#allocation1 + $0x1] ss:$4 sm:$0xff] %v1065_v59  ;;  %v546_v50 = vmul.f32 %v545_v48, %v1516_v62 }
 0x5e7   :  { %v552_v53 = vmul.f32 %v546_v50, %v546_v50 }
 0x5ec   :  { %v1080_v60 = vld.sshfl [vmem:[#allocation1] sm:$0xff pattern:$0x73625140] }
 0x5ed   :  { %1224 = vmatmul.msk.f32.vlgmr.msrb.gmra.mxu2 %vm918_vm2, %v1080_v60 }
 0x670   :  { %v1100_v61 = vpop.f32.mrf.mxu2 }
 0x671   :  { %v1101_v37 = vadd.f32 %v1247_v29, %v1100_v61  ;;  %v555_v61 = vsub.f32 %v1788_v39, %v546_v50 }
 0x673   :  { %v1103_v63 = vsel %vm542_vm7, %v1101_v37, 0.0  ;;  %v1107_v0 = vmul.f32 %v1101_v37, %v1101_v37 }
 0x674   :  { %1104 = vadd.xlane.f32.xlu1 %v1103_v63 }
 0x675   :  { %v1108_v3 = vsel %vm542_vm7, %v1107_v0, 0.0  ;;  %v1251_v0 = vld [vmem:[%s1875_s12] ss:$0 sm:$0xff] }
 0x676   :  { %1109 = vadd.xlane.f32.xlu0 %v1108_v3 }
 0x67c   :  { %549 = vadd.xlane.f32.xlu1 %v548_v6 }
 0x6e7   :  { %v1105_v8 = vpop.xlane.xlu1 %1104 }
 0x6e8   :  { %v1106_v1 = vmul.f32 %v1105_v8, %v1516_v62 }
 0x6e9   :  { %v1110_v13 = vpop.xlane.xlu0 %1109 }
 0x6ea   :  { %v1112_v14 = vmul.f32 %v1106_v1, %v1106_v1  ;;  %v1111_v15 = vmul.f32 %v1110_v13, %v1516_v62  ;;  %v1115_v25 = vsub.f32 %v1101_v37, %v1106_v1 }
 0x6ec   :  { %v1113_v16 = vsub.f32 %v1111_v15, %v1112_v14 }
 0x6ee   :  { %v1114_v18 = vmax.f32 %v1113_v16, 0.0 }
 0x6ef   :  { %v550_v49 = vpop.xlane.xlu1 %549 }
 0x6f0   :  { %v1116_v2 = vadd.f32 1e-05, %v1114_v18  ;;  %v551_v51 = vmul.f32 %v550_v49, %v1516_v62  ;;  %v1249_v62 = vld [vmem:[%s1921_s25] ss:$0 sm:$0xff] }
 0x6f2   :  { %1267 = vrsqrt.f32 %v1116_v2  ;;  %vm1123_vm8 = vweird.f32 %v1116_v2  ;;  %v553_v54 = vsub.f32 %v551_v51, %v552_v53 }
 0x6f4   :  { %v554_v55 = vmax.f32 %v553_v54, 0.0 }
 0x6f6   :  { %v556_v56 = vadd.f32 1e-05, %v554_v55 }
 0x6f8   :  { %v1268_v7 = vpop.eup %1267  ;;  %1269 = vrsqrt.f32 %v556_v56  ;;  %vm563_vm0 = vweird.f32 %v556_v56 }
 0x6f9   :  { %v1118_v19 = vmul.f32 %v1268_v7, %v1116_v2  ;;  %vm1124_vm12 = vweird.f32 %v1268_v7 }
 0x6fa   :  { %vm1125_vm15 = vmor %vm1123_vm8, %vm1124_vm12 }
 0x6fb   :  { %v1119_v20 = vmul.f32 %v1268_v7, %v1118_v19 }
 0x6fd   :  { %v1120_v17 = vmul.f32 0.5, %v1119_v20 }
 0x6fe   :  { %v1270_v42 = vpop.eup %1269 }
 0x6ff   :  { %v1121_v23 = vsub.f32 1.5, %v1120_v17  ;;  %v558_v57 = vmul.f32 %v1270_v42, %v556_v56  ;;  %vm564_vm13 = vweird.f32 %v1270_v42 }
 0x700   :  { %vm565_vm2 = vmor %vm563_vm0, %vm564_vm13 }
 0x701   :  { %v1122_v24 = vmul.f32 %v1268_v7, %v1121_v23  ;;  %v559_v52 = vmul.f32 %v1270_v42, %v558_v57 }
 0x703   :  { %v1126_v10 = vsel %vm1125_vm15, %v1268_v7, %v1122_v24  ;;  %v560_v58 = vmul.f32 0.5, %v559_v52 }
 0x704   :  { %v1127_v26 = vmul.f32 %v1126_v10, %v1115_v25  ;;  %v1252_v25 = vld [vmem:[%s1889_s26] ss:$0 sm:$0xff] }
 0x705   :  { %v561_v59 = vsub.f32 1.5, %v560_v58 }
 0x706   :  { %v1132_v28 = vmul.f32 %v1248_v5, %v1127_v26 }
 0x707   :  { %v562_v60 = vmul.f32 %v1270_v42, %v561_v59 }
 0x708   :  { %v1137_v30 = vadd.f32 %v1250_v27, %v1132_v28 }
 0x709   :  { %v566_v29 = vsel %vm565_vm2, %v1270_v42, %v562_v60 }
 0x70a   :  { %v1138_v31 = vmax.f32 %v1137_v30, 0.0  ;;  %v567_v37 = vmul.f32 %v566_v29, %v555_v61 }
 0x70c   :  { %v1140_v33 = vrot.slane %v1138_v31, 2  ;;  %v1142_v12 = vsel %vm261_vm14, %v1138_v31, -inf  ;;  %v572_v63 = vmul.f32 %v1249_v62, %v567_v37 }
 0x70d   :  { %v1143_v34 = vrot.slane %v1142_v12, 4 }
 0x70e   :  { %v1149_v35 = vsel %vm261_vm14, %v1140_v33, -inf  ;;  %v577_v3 = vadd.f32 %v1251_v0, %v572_v63 }
 0x70f   :  { %v1144_v36 = vmax.f32 %v1142_v12, %v1143_v34  ;;  %v1150_v38 = vrot.slane %v1149_v35, 4 }
 0x710   :  { %v578_v4 = vmax.f32 %v577_v3, 0.0 }
 0x711   :  { %v1145_v40 = vrot.slane %v1144_v36, 2  ;;  %v1151_v41 = vmax.f32 %v1149_v35, %v1150_v38 }
 0x712   :  { %v580_v6 = vrot.slane %v578_v4, 2  ;;  %v582_v1 = vsel %vm261_vm14, %v578_v4, -inf }
 0x713   :  { %v1146_v43 = vmax.f32 %v1144_v36, %v1145_v40  ;;  %v1152_v9 = vrot.slane %v1151_v41, 2  ;;  %v583_v14 = vrot.slane %v582_v1, 4 }
 0x714   :  { %v589_v8 = vsel %vm261_vm14, %v580_v6, -inf  ;;  %vm1197_vm14 = vcmask 123904  }
 0x715   :  { %v1147_v44 = vrot.slane %v1146_v43, 1  ;;  %v1153_v45 = vmax.f32 %v1151_v41, %v1152_v9  ;;  %v590_v13 = vrot.slane %v589_v8, 4  ;;  %v584_v15 = vmax.f32 %v582_v1, %v583_v14 }
 0x717   :  { %v1154_v46 = vrot.slane %v1153_v45, 1  ;;  %v1148_v32 = vmax.f32 %v1146_v43, %v1147_v44  ;;  %v591_v39 = vmax.f32 %v589_v8, %v590_v13  ;;  %v585_v18 = vrot.slane %v584_v15, 2 }
 0x719   :  { %v1155_v11 = vmax.f32 %v1153_v45, %v1154_v46  ;;  %v592_v16 = vrot.slane %v591_v39, 2  ;;  %v586_v7 = vmax.f32 %v584_v15, %v585_v18 }
 0x71b   :  { %v1163_v47 = vsel %vm1158_vm3, %v1155_v11, %v1148_v32  ;;  %v593_v2 = vmax.f32 %v591_v39, %v592_v16  ;;  %v587_v20 = vrot.slane %v586_v7, 1 }
 0x71c   :  { %1164 = vrot.lane.b32.xlu1 %v1163_v47, %s1298_s28 }
 0x71d   :  { %v594_v19 = vrot.slane %v593_v2, 1  ;;  %v588_v22 = vmax.f32 %v586_v7, %v587_v20 }
 0x71f   :  { %v595_v21 = vmax.f32 %v593_v2, %v594_v19 }
 0x721   :  { %v1159_v17 = vsel %vm1158_vm3, %v595_v21, %v588_v22 }
 0x78e   :  { %v1165_v23 = vpop.permute.xlu1 %1164 }
 0x78f   :  { %v1167_v24 = vsel %vm133_vm5, %v1159_v17, %v1165_v23 }
 0x790   :  { %1225 = vmatmul.msk.f32.vlgmr.msrb.gmra.mxu0 %vm362_vm9, %v1167_v24 }
 0x80d   :  { %v1194_v5 = vpop.f32.mrf.mxu0 }
 0x80e   :  { %v1195_v10 = vadd.f32 %v1252_v25, %v1194_v5 }
 0x810   :  { %1198 = vst.msk [vmem:[#allocation2] sm:$0x3] %vm1197_vm14, %v1195_v10 }
 0x811   :  { %1209 = dma.vmem_to_hbm [thread:$0]  %s1205_s11, 32, %s1207_s3, [#allocation3]  }
 0x812   :  { %1295 = dma.done.wait [#allocation3], 32  }
 0x813   :  { %1296 = vsyncadd [#allocation3], 4294967264 }
 0x814   :  { %1214 = vsyncpa [#allocation3], 1 }

</bundles_post_ra>
